<compile_context>
chip_gen: v5e
topology: v5e:2x2
jax: 0.10.0
libtpu: 0.0.40
codegen_flags: <defaults>
</compile_context>

<pallas_src>
import functools

import jax
import jax.numpy as jnp
from jax import lax
from jax.experimental import pallas as pl
from jax.experimental.pallas import tpu as pltpu

_LANE = 128


def _round_up(x, m):
    return (x + m - 1) // m * m


def _pick_batch_tile(N, batch_tile):
    if (batch_tile is not None and N % batch_tile == 0
            and (batch_tile % 8 == 0 or batch_tile == N)):
        return batch_tile
    # >= 2 tiles (keeps both v7x TensorCores busy) when tiles stay 8-aligned.
    if N % 16 == 0:
        bt = N // 2
        while bt > 256 and bt % 16 == 0:   # stay VMEM-friendly; N % bt stays 0
            bt //= 2
        return bt
    return N


def _pick_time_tile(T, bt, gate_width, budget_bytes=16 * 1024 * 1024, cap=16):
    # Amortize per-grid-step overhead over several GRU steps while keeping the
    # double-buffered gi slab within a VMEM budget (headroom for v7x 64 MiB).
    per_step = 2 * bt * gate_width * 4
    tt = max(1, min(cap, T, budget_bytes // max(per_step, 1)))
    while T % tt:
        tt -= 1
    return tt


# --------------------------------------------------------------------------- #
# Kernel: T_TILE GRU steps per grid iteration; recurrence carried in VMEM.
# Only the recurrent projection h_prev @ W_hh^T runs inside the serial loop.
# --------------------------------------------------------------------------- #
def _gru_recurrence_kernel(gi_ref, whh_ref, bhn_ref, o_ref, h_ref, *, hp, t_tile):
    s = pl.program_id(1)

    @pl.when(s == 0)
    def _init():
        h_ref[...] = jnp.zeros_like(h_ref)

    whh = whh_ref[...]                              # (Hp, 3Hp)  matmul dtype
    b_hn = bhn_ref[...].astype(jnp.float32)         # (1, Hp)    n-gate hh bias

    def _sigmoid(v):
        # sigmoid(v) = 0.5*(tanh(v/2)+1): one EUP tanh, no exp/divide.
        return 0.5 * (jnp.tanh(0.5 * v) + 1.0)

    def step(i, h):
        gi = gi_ref[i].astype(jnp.float32)          # (bt, 3Hp) precomputed
        gh = jnp.dot(h.astype(whh.dtype), whh,
                     preferred_element_type=jnp.float32)       # (bt, 3Hp)
        # PyTorch gate order r, z, n; 128-aligned gate slots -> lane-dense slices.
        r = _sigmoid(gi[:, 0 * hp:1 * hp] + gh[:, 0 * hp:1 * hp])
        z = _sigmoid(gi[:, 1 * hp:2 * hp] + gh[:, 1 * hp:2 * hp])
        n = jnp.tanh(gi[:, 2 * hp:3 * hp] + r * (gh[:, 2 * hp:3 * hp] + b_hn))
        return n + z * (h - n)                      # == (1-z)*n + z*h

    h = lax.fori_loop(0, t_tile, step, h_ref[...], unroll=True)
    h_ref[...] = h

    @pl.when(s == pl.num_programs(1) - 1)
    def _fin():
        o_ref[...] = h.astype(o_ref.dtype)


# --------------------------------------------------------------------------- #
# Wrapper: shared GRU, returns the final hidden state per sequence.
# --------------------------------------------------------------------------- #
def gru_last_hidden(xs, w_ih, w_hh, b_ih, b_hh, *, batch_tile=None,
                    matmul_dtype=None):
    """xs: (N, T, E) batch-first; weights in PyTorch layout:
       w_ih (3H, E), w_hh (3H, H), b_ih (3H,), b_hh (3H,). Returns (N, H)."""
    assert xs.ndim == 3
    N, T, E = xs.shape
    H = w_hh.shape[1]
    assert w_ih.shape == (3 * H, E) and w_hh.shape == (3 * H, H)

    f32 = jnp.float32
    mm_dtype = xs.dtype if matmul_dtype is None else matmul_dtype
    Hp = _round_up(H, _LANE)            # lane-dense gate width
    G = 3 * Hp

    # ---- Wrapper-side layout + gate-slot padding (no in-kernel relayout). ----
    # Each PyTorch gate block (width H) goes at the start of a 128-aligned slot
    # of width Hp; padded rows/cols stay zero so padded lanes never leak.
    wih_t = jnp.transpose(w_ih).astype(f32)          # (E, 3H)
    whh_t = jnp.transpose(w_hh).astype(f32)          # (H, 3H)
    b_ih = b_ih.astype(f32)
    b_hh = b_hh.astype(f32)

    wih_pt = jnp.zeros((E, G), f32)
    whh_pt = jnp.zeros((Hp, G), f32)
    b_gi = jnp.zeros((G,), f32)                      # folded into hoisted gi
    b_hn = jnp.zeros((1, Hp), f32)                   # only bias kept in-loop
    for g in range(3):
        src = slice(g * H, (g + 1) * H)
        dst = slice(g * Hp, g * Hp + H)
        wih_pt = wih_pt.at[:, dst].set(wih_t[:, src])
        whh_pt = whh_pt.at[:H, dst].set(whh_t[:, src])
        if g < 2:          # r, z gates: fold b_ih + b_hh into gi
            b_gi = b_gi.at[dst].set(b_ih[src] + b_hh[src])
        else:              # n gate: b_hn must stay inside r * (W_hn h + b_hn)
            b_gi = b_gi.at[dst].set(b_ih[src])
            b_hn = b_hn.at[0, :H].set(b_hh[src])
    whh_pt = whh_pt.astype(mm_dtype)

    # ---- Hoisted input projection: one big MXU-friendly matmul, off the
    # serial recurrence.  The einsum emits the result directly time-major, so
    # there is no separate (N,T,E)->(T,N,E) relayout pass over HBM. ----
    gi = jnp.einsum('nte,eg->tng', xs.astype(f32), wih_pt,
                    preferred_element_type=f32) + b_gi        # (T, N, 3Hp) f32

    # ---- Tiling: batch axis "parallel" (megacore), time axis "arbitrary". ----
    bt = _pick_batch_tile(N, batch_tile)
    t_tile = _pick_time_tile(T, bt, G)

    kernel = functools.partial(_gru_recurrence_kernel, hp=Hp, t_tile=t_tile)

    # Rough per-step VMEM working set (pipeline double-buffers blocks).
    wset = (2 * t_tile * bt * G * 4                                   # gi slab
            + 2 * Hp * G * jnp.dtype(mm_dtype).itemsize               # W_hh^T
            + 2 * Hp * 4                                              # b_hn
            + 2 * bt * Hp * jnp.dtype(xs.dtype).itemsize              # output
            + bt * Hp * 4)                                            # h state
    cp_kwargs = dict(dimension_semantics=("parallel", "arbitrary"))
    if wset > 24 * 1024 * 1024:
        # Raise the scoped-VMEM cap only when the working set needs it; stay
        # under the 64 MiB physical VMEM of v7x.
        cp_kwargs["vmem_limit_bytes"] = min(int(wset * 3 // 2), 64 * 1024 * 1024)

    out = pl.pallas_call(
        kernel,
        out_shape=jax.ShapeDtypeStruct((N, Hp), xs.dtype),
        grid_spec=pltpu.PrefetchScalarGridSpec(
            num_scalar_prefetch=0,
            grid=(N // bt, T // t_tile),             # (batch tiles, time tiles)
            in_specs=[
                pl.BlockSpec((t_tile, bt, G), lambda b, s: (s, b, 0)),  # gi slab
                pl.BlockSpec((Hp, G), lambda b, s: (0, 0)),             # W_hh^T
                pl.BlockSpec((1, Hp), lambda b, s: (0, 0)),             # b_hn
            ],
            out_specs=pl.BlockSpec((bt, Hp), lambda b, s: (b, 0)),
            scratch_shapes=[pltpu.VMEM((bt, Hp), jnp.float32)],         # h state
        ),
        compiler_params=pltpu.CompilerParams(**cp_kwargs),
    )(gi, whh_pt, b_hn)
    return out[:, :H]


def siamese_net_forward(x, y, w_ih, w_hh, b_ih, b_hh):
    """SiameseNet.forward for gather_type='gru': shared GRU over x and y,
    returns (hid_x, hid_y), each (batch, embd_size)."""
    # TODO(synk): transformer gather path and PackedSequence (variable-length)
    # inputs are not implemented; dense (B, T, E) sequences only.
    B = x.shape[0]
    xy = jnp.concatenate([x, y], axis=0)             # shared weights -> one pass
    hid = gru_last_hidden(xy, w_ih, w_hh, b_ih, b_hh)
    return hid[:B], hid[B:]


# --------------------------------------------------------------------------- #
# Pure-JAX reference (mirrors torch.nn.GRU semantics, h0 = 0).
# --------------------------------------------------------------------------- #
def _gru_reference(xs, w_ih, w_hh, b_ih, b_hh):
    N, T, E = xs.shape
    H = w_hh.shape[1]

    def step(h, x_t):
        gi = x_t @ w_ih.T + b_ih
        gh = h @ w_hh.T + b_hh
        r = jax.nn.sigmoid(gi[:, :H] + gh[:, :H])
        z = jax.nn.sigmoid(gi[:, H:2 * H] + gh[:, H:2 * H])
        n = jnp.tanh(gi[:, 2 * H:] + r * gh[:, 2 * H:])
        h_new = (1.0 - z) * n + z * h
        return h_new, None

    h0 = jnp.zeros((N, H), xs.dtype)
    h_final, _ = lax.scan(step, h0, jnp.transpose(xs, (1, 0, 2)))
    return h_final


if __name__ == "__main__":
    key = jax.random.PRNGKey(0)
    kx, ky, kw1, kw2, kb1, kb2 = jax.random.split(key, 6)

    B, T, E = 2, 8, 32       # batch=2, seq=8, embd_size=32
    H = E
    scale = 1.0 / (H ** 0.5)

    x = jax.random.normal(kx, (B, T, E), dtype=jnp.float32)
    y = jax.random.normal(ky, (B, T, E), dtype=jnp.float32)
    w_ih = jax.random.uniform(kw1, (3 * H, E), jnp.float32, -scale, scale)
    w_hh = jax.random.uniform(kw2, (3 * H, H), jnp.float32, -scale, scale)
    b_ih = jax.random.uniform(kb1, (3 * H,), jnp.float32, -scale, scale)
    b_hh = jax.random.uniform(kb2, (3 * H,), jnp.float32, -scale, scale)

    fwd = jax.jit(lambda a, b: siamese_net_forward(a, b, w_ih, w_hh, b_ih, b_hh))
    hid_x, hid_y = fwd(x, y)
    jax.block_until_ready((hid_x, hid_y))

    ref_x = _gru_reference(x, w_ih, w_hh, b_ih, b_hh)
    ref_y = _gru_reference(y, w_ih, w_hh, b_ih, b_hh)

    assert hid_x.shape == (B, H) and hid_y.shape == (B, H)
    assert jnp.allclose(hid_x, ref_x, atol=1e-4, rtol=1e-4), (hid_x, ref_x)
    assert jnp.allclose(hid_y, ref_y, atol=1e-4, rtol=1e-4), (hid_y, ref_y)

    print("KERNEL_OK")
</pallas_src>

<mosaic_0001>
module attributes {stable_mosaic.version = 11 : i64} {
  func.func @_gru_recurrence_kernel(%arg0: i32, %arg1: i32, %arg2: memref<8x4x384xf32, #tpu.memory_space<vmem>>, %arg3: memref<128x384xf32, #tpu.memory_space<vmem>>, %arg4: memref<1x128xf32, #tpu.memory_space<vmem>>, %arg5: memref<4x128xf32, #tpu.memory_space<vmem>>, %arg6: memref<4x128xf32, #tpu.memory_space<vmem>>) attributes {dimension_semantics = [#tpu.dimension_semantics<parallel>, #tpu.dimension_semantics<arbitrary>], iteration_bounds = array<i64: 1, 1>, scalar_prefetch = 0 : i64, scratch_operands = 1 : i64, tpu.core_type = #tpu.core_type<tc>, window_params = [{transform_indices = @transform_0, window_bounds = array<i64: 8, 4, 384>}, {pipeline_mode = #tpu.pipeline_mode<synchronous>, transform_indices = @transform_1, window_bounds = array<i64: 128, 384>}, {pipeline_mode = #tpu.pipeline_mode<synchronous>, transform_indices = @transform_2, window_bounds = array<i64: 1, 128>}, {transform_indices = @transform_3, window_bounds = array<i64: 4, 128>}]} {
    %c0_i32 = arith.constant 0 : i32
    %0 = arith.cmpi eq, %arg1, %c0_i32 : i32
    %1 = arith.extui %0 : i1 to i32
    %c0_i32_0 = arith.constant 0 : i32
    %2 = arith.cmpi ne, %1, %c0_i32_0 : i32
    scf.if %2 {
      %cst_82 = arith.constant 0.000000e+00 : f32
      %282 = vector.broadcast %cst_82 : f32 to vector<4x128xf32>
      %c0_83 = arith.constant 0 : index
      %c0_84 = arith.constant 0 : index
      %283 = vector.load %arg6[%c0_83, %c0_84] : memref<4x128xf32, #tpu.memory_space<vmem>>, vector<4x128xf32>
      tpu.vector_store %arg6[%c0_83, %c0_84], %282 {strides = array<i32>} : memref<4x128xf32, #tpu.memory_space<vmem>>, vector<4x128xf32>,
    } else {
    }
    %c0 = arith.constant 0 : index
    %c0_1 = arith.constant 0 : index
    %3 = vector.load %arg3[%c0, %c0_1] : memref<128x384xf32, #tpu.memory_space<vmem>>, vector<128x384xf32>
    %c0_2 = arith.constant 0 : index
    %c0_3 = arith.constant 0 : index
    %4 = vector.load %arg4[%c0_2, %c0_3] : memref<1x128xf32, #tpu.memory_space<vmem>>, vector<1x128xf32>
    %c0_4 = arith.constant 0 : index
    %c0_5 = arith.constant 0 : index
    %5 = vector.load %arg6[%c0_4, %c0_5] : memref<4x128xf32, #tpu.memory_space<vmem>>, vector<4x128xf32>
    %c0_i32_6 = arith.constant 0 : i32
    %6 = arith.index_cast %c0_i32_6 : i32 to index
    %c0_7 = arith.constant 0 : index
    %c0_8 = arith.constant 0 : index
    %7 = vector.load %arg2[%6, %c0_7, %c0_8] : memref<8x4x384xf32, #tpu.memory_space<vmem>>, vector<1x4x384xf32>
    %8 = vector.shape_cast %7 : vector<1x4x384xf32> to vector<4x384xf32>
    %cst = arith.constant dense<0.000000e+00> : vector<4x384xf32>
    %9 = tpu.matmul %5, %3, %cst {dimension_numbers = #tpu.dot_dimension_numbers<[1], [0], [0], [1], [0, 0, 1, 1], [], []>} : vector<4x128xf32>, vector<128x384xf32>, vector<4x384xf32> -> vector<4x384xf32>
    %10 = vector.extract_strided_slice %8 {offsets = [0, 0], sizes = [4, 128], strides = [1, 1]} : vector<4x384xf32> to vector<4x128xf32>
    %11 = vector.extract_strided_slice %9 {offsets = [0, 0], sizes = [4, 128], strides = [1, 1]} : vector<4x384xf32> to vector<4x128xf32>
    %12 = arith.addf %10, %11 : vector<4x128xf32>
    %cst_9 = arith.constant 5.000000e-01 : f32
    %13 = vector.broadcast %cst_9 : f32 to vector<4x128xf32>
    %14 = arith.mulf %13, %12 : vector<4x128xf32>
    %15 = math.tanh %14 : vector<4x128xf32>
    %cst_10 = arith.constant 1.000000e+00 : f32
    %16 = vector.broadcast %cst_10 : f32 to vector<4x128xf32>
    %17 = arith.addf %15, %16 : vector<4x128xf32>
    %cst_11 = arith.constant 5.000000e-01 : f32
    %18 = vector.broadcast %cst_11 : f32 to vector<4x128xf32>
    %19 = arith.mulf %18, %17 : vector<4x128xf32>
    %20 = vector.extract_strided_slice %8 {offsets = [0, 128], sizes = [4, 128], strides = [1, 1]} : vector<4x384xf32> to vector<4x128xf32>
    %21 = vector.extract_strided_slice %9 {offsets = [0, 128], sizes = [4, 128], strides = [1, 1]} : vector<4x384xf32> to vector<4x128xf32>
    %22 = arith.addf %20, %21 : vector<4x128xf32>
    %cst_12 = arith.constant 5.000000e-01 : f32
    %23 = vector.broadcast %cst_12 : f32 to vector<4x128xf32>
    %24 = arith.mulf %23, %22 : vector<4x128xf32>
    %25 = math.tanh %24 : vector<4x128xf32>
    %cst_13 = arith.constant 1.000000e+00 : f32
    %26 = vector.broadcast %cst_13 : f32 to vector<4x128xf32>
    %27 = arith.addf %25, %26 : vector<4x128xf32>
    %cst_14 = arith.constant 5.000000e-01 : f32
    %28 = vector.broadcast %cst_14 : f32 to vector<4x128xf32>
    %29 = arith.mulf %28, %27 : vector<4x128xf32>
    %30 = vector.extract_strided_slice %8 {offsets = [0, 256], sizes = [4, 128], strides = [1, 1]} : vector<4x384xf32> to vector<4x128xf32>
    %31 = vector.extract_strided_slice %9 {offsets = [0, 256], sizes = [4, 128], strides = [1, 1]} : vector<4x384xf32> to vector<4x128xf32>
    %32 = vector.broadcast %4 : vector<1x128xf32> to vector<4x128xf32>
    %33 = arith.addf %31, %32 : vector<4x128xf32>
    %34 = arith.mulf %19, %33 : vector<4x128xf32>
    %35 = arith.addf %30, %34 : vector<4x128xf32>
    %36 = math.tanh %35 : vector<4x128xf32>
    %37 = arith.subf %5, %36 : vector<4x128xf32>
    %38 = arith.mulf %29, %37 : vector<4x128xf32>
    %39 = arith.addf %36, %38 : vector<4x128xf32>
    %c1_i32 = arith.constant 1 : i32
    %40 = arith.index_cast %c1_i32 : i32 to index
    %c0_15 = arith.constant 0 : index
    %c0_16 = arith.constant 0 : index
    %41 = vector.load %arg2[%40, %c0_15, %c0_16] : memref<8x4x384xf32, #tpu.memory_space<vmem>>, vector<1x4x384xf32>
    %42 = vector.shape_cast %41 : vector<1x4x384xf32> to vector<4x384xf32>
    %cst_17 = arith.constant dense<0.000000e+00> : vector<4x384xf32>
    %43 = tpu.matmul %39, %3, %cst_17 {dimension_numbers = #tpu.dot_dimension_numbers<[1], [0], [0], [1], [0, 0, 1, 1], [], []>} : vector<4x128xf32>, vector<128x384xf32>, vector<4x384xf32> -> vector<4x384xf32>
    %44 = vector.extract_strided_slice %42 {offsets = [0, 0], sizes = [4, 128], strides = [1, 1]} : vector<4x384xf32> to vector<4x128xf32>
    %45 = vector.extract_strided_slice %43 {offsets = [0, 0], sizes = [4, 128], strides = [1, 1]} : vector<4x384xf32> to vector<4x128xf32>
    %46 = arith.addf %44, %45 : vector<4x128xf32>
    %cst_18 = arith.constant 5.000000e-01 : f32
    %47 = vector.broadcast %cst_18 : f32 to vector<4x128xf32>
    %48 = arith.mulf %47, %46 : vector<4x128xf32>
    %49 = math.tanh %48 : vector<4x128xf32>
    %cst_19 = arith.constant 1.000000e+00 : f32
    %50 = vector.broadcast %cst_19 : f32 to vector<4x128xf32>
    %51 = arith.addf %49, %50 : vector<4x128xf32>
    %cst_20 = arith.constant 5.000000e-01 : f32
    %52 = vector.broadcast %cst_20 : f32 to vector<4x128xf32>
    %53 = arith.mulf %52, %51 : vector<4x128xf32>
    %54 = vector.extract_strided_slice %42 {offsets = [0, 128], sizes = [4, 128], strides = [1, 1]} : vector<4x384xf32> to vector<4x128xf32>
    %55 = vector.extract_strided_slice %43 {offsets = [0, 128], sizes = [4, 128], strides = [1, 1]} : vector<4x384xf32> to vector<4x128xf32>
    %56 = arith.addf %54, %55 : vector<4x128xf32>
    %cst_21 = arith.constant 5.000000e-01 : f32
    %57 = vector.broadcast %cst_21 : f32 to vector<4x128xf32>
    %58 = arith.mulf %57, %56 : vector<4x128xf32>
    %59 = math.tanh %58 : vector<4x128xf32>
    %cst_22 = arith.constant 1.000000e+00 : f32
    %60 = vector.broadcast %cst_22 : f32 to vector<4x128xf32>
    %61 = arith.addf %59, %60 : vector<4x128xf32>
    %cst_23 = arith.constant 5.000000e-01 : f32
    %62 = vector.broadcast %cst_23 : f32 to vector<4x128xf32>
    %63 = arith.mulf %62, %61 : vector<4x128xf32>
    %64 = vector.extract_strided_slice %42 {offsets = [0, 256], sizes = [4, 128], strides = [1, 1]} : vector<4x384xf32> to vector<4x128xf32>
    %65 = vector.extract_strided_slice %43 {offsets = [0, 256], sizes = [4, 128], strides = [1, 1]} : vector<4x384xf32> to vector<4x128xf32>
    %66 = vector.broadcast %4 : vector<1x128xf32> to vector<4x128xf32>
    %67 = arith.addf %65, %66 : vector<4x128xf32>
    %68 = arith.mulf %53, %67 : vector<4x128xf32>
    %69 = arith.addf %64, %68 : vector<4x128xf32>
    %70 = math.tanh %69 : vector<4x128xf32>
    %71 = arith.subf %39, %70 : vector<4x128xf32>
    %72 = arith.mulf %63, %71 : vector<4x128xf32>
    %73 = arith.addf %70, %72 : vector<4x128xf32>
    %c2_i32 = arith.constant 2 : i32
    %74 = arith.index_cast %c2_i32 : i32 to index
    %c0_24 = arith.constant 0 : index
    %c0_25 = arith.constant 0 : index
    %75 = vector.load %arg2[%74, %c0_24, %c0_25] : memref<8x4x384xf32, #tpu.memory_space<vmem>>, vector<1x4x384xf32>
    %76 = vector.shape_cast %75 : vector<1x4x384xf32> to vector<4x384xf32>
    %cst_26 = arith.constant dense<0.000000e+00> : vector<4x384xf32>
    %77 = tpu.matmul %73, %3, %cst_26 {dimension_numbers = #tpu.dot_dimension_numbers<[1], [0], [0], [1], [0, 0, 1, 1], [], []>} : vector<4x128xf32>, vector<128x384xf32>, vector<4x384xf32> -> vector<4x384xf32>
    %78 = vector.extract_strided_slice %76 {offsets = [0, 0], sizes = [4, 128], strides = [1, 1]} : vector<4x384xf32> to vector<4x128xf32>
    %79 = vector.extract_strided_slice %77 {offsets = [0, 0], sizes = [4, 128], strides = [1, 1]} : vector<4x384xf32> to vector<4x128xf32>
    %80 = arith.addf %78, %79 : vector<4x128xf32>
    %cst_27 = arith.constant 5.000000e-01 : f32
    %81 = vector.broadcast %cst_27 : f32 to vector<4x128xf32>
    %82 = arith.mulf %81, %80 : vector<4x128xf32>
    %83 = math.tanh %82 : vector<4x128xf32>
    %cst_28 = arith.constant 1.000000e+00 : f32
    %84 = vector.broadcast %cst_28 : f32 to vector<4x128xf32>
    %85 = arith.addf %83, %84 : vector<4x128xf32>
    %cst_29 = arith.constant 5.000000e-01 : f32
    %86 = vector.broadcast %cst_29 : f32 to vector<4x128xf32>
    %87 = arith.mulf %86, %85 : vector<4x128xf32>
    %88 = vector.extract_strided_slice %76 {offsets = [0, 128], sizes = [4, 128], strides = [1, 1]} : vector<4x384xf32> to vector<4x128xf32>
    %89 = vector.extract_strided_slice %77 {offsets = [0, 128], sizes = [4, 128], strides = [1, 1]} : vector<4x384xf32> to vector<4x128xf32>
    %90 = arith.addf %88, %89 : vector<4x128xf32>
    %cst_30 = arith.constant 5.000000e-01 : f32
    %91 = vector.broadcast %cst_30 : f32 to vector<4x128xf32>
    %92 = arith.mulf %91, %90 : vector<4x128xf32>
    %93 = math.tanh %92 : vector<4x128xf32>
    %cst_31 = arith.constant 1.000000e+00 : f32
    %94 = vector.broadcast %cst_31 : f32 to vector<4x128xf32>
    %95 = arith.addf %93, %94 : vector<4x128xf32>
    %cst_32 = arith.constant 5.000000e-01 : f32
    %96 = vector.broadcast %cst_32 : f32 to vector<4x128xf32>
    %97 = arith.mulf %96, %95 : vector<4x128xf32>
    %98 = vector.extract_strided_slice %76 {offsets = [0, 256], sizes = [4, 128], strides = [1, 1]} : vector<4x384xf32> to vector<4x128xf32>
    %99 = vector.extract_strided_slice %77 {offsets = [0, 256], sizes = [4, 128], strides = [1, 1]} : vector<4x384xf32> to vector<4x128xf32>
    %100 = vector.broadcast %4 : vector<1x128xf32> to vector<4x128xf32>
    %101 = arith.addf %99, %100 : vector<4x128xf32>
    %102 = arith.mulf %87, %101 : vector<4x128xf32>
    %103 = arith.addf %98, %102 : vector<4x128xf32>
    %104 = math.tanh %103 : vector<4x128xf32>
    %105 = arith.subf %73, %104 : vector<4x128xf32>
    %106 = arith.mulf %97, %105 : vector<4x128xf32>
    %107 = arith.addf %104, %106 : vector<4x128xf32>
    %c3_i32 = arith.constant 3 : i32
    %108 = arith.index_cast %c3_i32 : i32 to index
    %c0_33 = arith.constant 0 : index
    %c0_34 = arith.constant 0 : index
    %109 = vector.load %arg2[%108, %c0_33, %c0_34] : memref<8x4x384xf32, #tpu.memory_space<vmem>>, vector<1x4x384xf32>
    %110 = vector.shape_cast %109 : vector<1x4x384xf32> to vector<4x384xf32>
    %cst_35 = arith.constant dense<0.000000e+00> : vector<4x384xf32>
    %111 = tpu.matmul %107, %3, %cst_35 {dimension_numbers = #tpu.dot_dimension_numbers<[1], [0], [0], [1], [0, 0, 1, 1], [], []>} : vector<4x128xf32>, vector<128x384xf32>, vector<4x384xf32> -> vector<4x384xf32>
    %112 = vector.extract_strided_slice %110 {offsets = [0, 0], sizes = [4, 128], strides = [1, 1]} : vector<4x384xf32> to vector<4x128xf32>
    %113 = vector.extract_strided_slice %111 {offsets = [0, 0], sizes = [4, 128], strides = [1, 1]} : vector<4x384xf32> to vector<4x128xf32>
    %114 = arith.addf %112, %113 : vector<4x128xf32>
    %cst_36 = arith.constant 5.000000e-01 : f32
    %115 = vector.broadcast %cst_36 : f32 to vector<4x128xf32>
    %116 = arith.mulf %115, %114 : vector<4x128xf32>
    %117 = math.tanh %116 : vector<4x128xf32>
    %cst_37 = arith.constant 1.000000e+00 : f32
    %118 = vector.broadcast %cst_37 : f32 to vector<4x128xf32>
    %119 = arith.addf %117, %118 : vector<4x128xf32>
    %cst_38 = arith.constant 5.000000e-01 : f32
    %120 = vector.broadcast %cst_38 : f32 to vector<4x128xf32>
    %121 = arith.mulf %120, %119 : vector<4x128xf32>
    %122 = vector.extract_strided_slice %110 {offsets = [0, 128], sizes = [4, 128], strides = [1, 1]} : vector<4x384xf32> to vector<4x128xf32>
    %123 = vector.extract_strided_slice %111 {offsets = [0, 128], sizes = [4, 128], strides = [1, 1]} : vector<4x384xf32> to vector<4x128xf32>
    %124 = arith.addf %122, %123 : vector<4x128xf32>
    %cst_39 = arith.constant 5.000000e-01 : f32
    %125 = vector.broadcast %cst_39 : f32 to vector<4x128xf32>
    %126 = arith.mulf %125, %124 : vector<4x128xf32>
    %127 = math.tanh %126 : vector<4x128xf32>
    %cst_40 = arith.constant 1.000000e+00 : f32
    %128 = vector.broadcast %cst_40 : f32 to vector<4x128xf32>
    %129 = arith.addf %127, %128 : vector<4x128xf32>
    %cst_41 = arith.constant 5.000000e-01 : f32
    %130 = vector.broadcast %cst_41 : f32 to vector<4x128xf32>
    %131 = arith.mulf %130, %129 : vector<4x128xf32>
    %132 = vector.extract_strided_slice %110 {offsets = [0, 256], sizes = [4, 128], strides = [1, 1]} : vector<4x384xf32> to vector<4x128xf32>
    %133 = vector.extract_strided_slice %111 {offsets = [0, 256], sizes = [4, 128], strides = [1, 1]} : vector<4x384xf32> to vector<4x128xf32>
    %134 = vector.broadcast %4 : vector<1x128xf32> to vector<4x128xf32>
    %135 = arith.addf %133, %134 : vector<4x128xf32>
    %136 = arith.mulf %121, %135 : vector<4x128xf32>
    %137 = arith.addf %132, %136 : vector<4x128xf32>
    %138 = math.tanh %137 : vector<4x128xf32>
    %139 = arith.subf %107, %138 : vector<4x128xf32>
    %140 = arith.mulf %131, %139 : vector<4x128xf32>
    %141 = arith.addf %138, %140 : vector<4x128xf32>
    %c4_i32 = arith.constant 4 : i32
    %142 = arith.index_cast %c4_i32 : i32 to index
    %c0_42 = arith.constant 0 : index
    %c0_43 = arith.constant 0 : index
    %143 = vector.load %arg2[%142, %c0_42, %c0_43] : memref<8x4x384xf32, #tpu.memory_space<vmem>>, vector<1x4x384xf32>
    %144 = vector.shape_cast %143 : vector<1x4x384xf32> to vector<4x384xf32>
    %cst_44 = arith.constant dense<0.000000e+00> : vector<4x384xf32>
    %145 = tpu.matmul %141, %3, %cst_44 {dimension_numbers = #tpu.dot_dimension_numbers<[1], [0], [0], [1], [0, 0, 1, 1], [], []>} : vector<4x128xf32>, vector<128x384xf32>, vector<4x384xf32> -> vector<4x384xf32>
    %146 = vector.extract_strided_slice %144 {offsets = [0, 0], sizes = [4, 128], strides = [1, 1]} : vector<4x384xf32> to vector<4x128xf32>
    %147 = vector.extract_strided_slice %145 {offsets = [0, 0], sizes = [4, 128], strides = [1, 1]} : vector<4x384xf32> to vector<4x128xf32>
    %148 = arith.addf %146, %147 : vector<4x128xf32>
    %cst_45 = arith.constant 5.000000e-01 : f32
    %149 = vector.broadcast %cst_45 : f32 to vector<4x128xf32>
    %150 = arith.mulf %149, %148 : vector<4x128xf32>
    %151 = math.tanh %150 : vector<4x128xf32>
    %cst_46 = arith.constant 1.000000e+00 : f32
    %152 = vector.broadcast %cst_46 : f32 to vector<4x128xf32>
    %153 = arith.addf %151, %152 : vector<4x128xf32>
    %cst_47 = arith.constant 5.000000e-01 : f32
    %154 = vector.broadcast %cst_47 : f32 to vector<4x128xf32>
    %155 = arith.mulf %154, %153 : vector<4x128xf32>
    %156 = vector.extract_strided_slice %144 {offsets = [0, 128], sizes = [4, 128], strides = [1, 1]} : vector<4x384xf32> to vector<4x128xf32>
    %157 = vector.extract_strided_slice %145 {offsets = [0, 128], sizes = [4, 128], strides = [1, 1]} : vector<4x384xf32> to vector<4x128xf32>
    %158 = arith.addf %156, %157 : vector<4x128xf32>
    %cst_48 = arith.constant 5.000000e-01 : f32
    %159 = vector.broadcast %cst_48 : f32 to vector<4x128xf32>
    %160 = arith.mulf %159, %158 : vector<4x128xf32>
    %161 = math.tanh %160 : vector<4x128xf32>
    %cst_49 = arith.constant 1.000000e+00 : f32
    %162 = vector.broadcast %cst_49 : f32 to vector<4x128xf32>
    %163 = arith.addf %161, %162 : vector<4x128xf32>
    %cst_50 = arith.constant 5.000000e-01 : f32
    %164 = vector.broadcast %cst_50 : f32 to vector<4x128xf32>
    %165 = arith.mulf %164, %163 : vector<4x128xf32>
    %166 = vector.extract_strided_slice %144 {offsets = [0, 256], sizes = [4, 128], strides = [1, 1]} : vector<4x384xf32> to vector<4x128xf32>
    %167 = vector.extract_strided_slice %145 {offsets = [0, 256], sizes = [4, 128], strides = [1, 1]} : vector<4x384xf32> to vector<4x128xf32>
    %168 = vector.broadcast %4 : vector<1x128xf32> to vector<4x128xf32>
    %169 = arith.addf %167, %168 : vector<4x128xf32>
    %170 = arith.mulf %155, %169 : vector<4x128xf32>
    %171 = arith.addf %166, %170 : vector<4x128xf32>
    %172 = math.tanh %171 : vector<4x128xf32>
    %173 = arith.subf %141, %172 : vector<4x128xf32>
    %174 = arith.mulf %165, %173 : vector<4x128xf32>
    %175 = arith.addf %172, %174 : vector<4x128xf32>
    %c5_i32 = arith.constant 5 : i32
    %176 = arith.index_cast %c5_i32 : i32 to index
    %c0_51 = arith.constant 0 : index
    %c0_52 = arith.constant 0 : index
    %177 = vector.load %arg2[%176, %c0_51, %c0_52] : memref<8x4x384xf32, #tpu.memory_space<vmem>>, vector<1x4x384xf32>
    %178 = vector.shape_cast %177 : vector<1x4x384xf32> to vector<4x384xf32>
    %cst_53 = arith.constant dense<0.000000e+00> : vector<4x384xf32>
    %179 = tpu.matmul %175, %3, %cst_53 {dimension_numbers = #tpu.dot_dimension_numbers<[1], [0], [0], [1], [0, 0, 1, 1], [], []>} : vector<4x128xf32>, vector<128x384xf32>, vector<4x384xf32> -> vector<4x384xf32>
    %180 = vector.extract_strided_slice %178 {offsets = [0, 0], sizes = [4, 128], strides = [1, 1]} : vector<4x384xf32> to vector<4x128xf32>
    %181 = vector.extract_strided_slice %179 {offsets = [0, 0], sizes = [4, 128], strides = [1, 1]} : vector<4x384xf32> to vector<4x128xf32>
    %182 = arith.addf %180, %181 : vector<4x128xf32>
    %cst_54 = arith.constant 5.000000e-01 : f32
    %183 = vector.broadcast %cst_54 : f32 to vector<4x128xf32>
    %184 = arith.mulf %183, %182 : vector<4x128xf32>
    %185 = math.tanh %184 : vector<4x128xf32>
    %cst_55 = arith.constant 1.000000e+00 : f32
    %186 = vector.broadcast %cst_55 : f32 to vector<4x128xf32>
    %187 = arith.addf %185, %186 : vector<4x128xf32>
    %cst_56 = arith.constant 5.000000e-01 : f32
    %188 = vector.broadcast %cst_56 : f32 to vector<4x128xf32>
    %189 = arith.mulf %188, %187 : vector<4x128xf32>
    %190 = vector.extract_strided_slice %178 {offsets = [0, 128], sizes = [4, 128], strides = [1, 1]} : vector<4x384xf32> to vector<4x128xf32>
    %191 = vector.extract_strided_slice %179 {offsets = [0, 128], sizes = [4, 128], strides = [1, 1]} : vector<4x384xf32> to vector<4x128xf32>
    %192 = arith.addf %190, %191 : vector<4x128xf32>
    %cst_57 = arith.constant 5.000000e-01 : f32
    %193 = vector.broadcast %cst_57 : f32 to vector<4x128xf32>
    %194 = arith.mulf %193, %192 : vector<4x128xf32>
    %195 = math.tanh %194 : vector<4x128xf32>
    %cst_58 = arith.constant 1.000000e+00 : f32
    %196 = vector.broadcast %cst_58 : f32 to vector<4x128xf32>
    %197 = arith.addf %195, %196 : vector<4x128xf32>
    %cst_59 = arith.constant 5.000000e-01 : f32
    %198 = vector.broadcast %cst_59 : f32 to vector<4x128xf32>
    %199 = arith.mulf %198, %197 : vector<4x128xf32>
    %200 = vector.extract_strided_slice %178 {offsets = [0, 256], sizes = [4, 128], strides = [1, 1]} : vector<4x384xf32> to vector<4x128xf32>
    %201 = vector.extract_strided_slice %179 {offsets = [0, 256], sizes = [4, 128], strides = [1, 1]} : vector<4x384xf32> to vector<4x128xf32>
    %202 = vector.broadcast %4 : vector<1x128xf32> to vector<4x128xf32>
    %203 = arith.addf %201, %202 : vector<4x128xf32>
    %204 = arith.mulf %189, %203 : vector<4x128xf32>
    %205 = arith.addf %200, %204 : vector<4x128xf32>
    %206 = math.tanh %205 : vector<4x128xf32>
    %207 = arith.subf %175, %206 : vector<4x128xf32>
    %208 = arith.mulf %199, %207 : vector<4x128xf32>
    %209 = arith.addf %206, %208 : vector<4x128xf32>
    %c6_i32 = arith.constant 6 : i32
    %210 = arith.index_cast %c6_i32 : i32 to index
    %c0_60 = arith.constant 0 : index
    %c0_61 = arith.constant 0 : index
    %211 = vector.load %arg2[%210, %c0_60, %c0_61] : memref<8x4x384xf32, #tpu.memory_space<vmem>>, vector<1x4x384xf32>
    %212 = vector.shape_cast %211 : vector<1x4x384xf32> to vector<4x384xf32>
    %cst_62 = arith.constant dense<0.000000e+00> : vector<4x384xf32>
    %213 = tpu.matmul %209, %3, %cst_62 {dimension_numbers = #tpu.dot_dimension_numbers<[1], [0], [0], [1], [0, 0, 1, 1], [], []>} : vector<4x128xf32>, vector<128x384xf32>, vector<4x384xf32> -> vector<4x384xf32>
    %214 = vector.extract_strided_slice %212 {offsets = [0, 0], sizes = [4, 128], strides = [1, 1]} : vector<4x384xf32> to vector<4x128xf32>
    %215 = vector.extract_strided_slice %213 {offsets = [0, 0], sizes = [4, 128], strides = [1, 1]} : vector<4x384xf32> to vector<4x128xf32>
    %216 = arith.addf %214, %215 : vector<4x128xf32>
    %cst_63 = arith.constant 5.000000e-01 : f32
    %217 = vector.broadcast %cst_63 : f32 to vector<4x128xf32>
    %218 = arith.mulf %217, %216 : vector<4x128xf32>
    %219 = math.tanh %218 : vector<4x128xf32>
    %cst_64 = arith.constant 1.000000e+00 : f32
    %220 = vector.broadcast %cst_64 : f32 to vector<4x128xf32>
    %221 = arith.addf %219, %220 : vector<4x128xf32>
    %cst_65 = arith.constant 5.000000e-01 : f32
    %222 = vector.broadcast %cst_65 : f32 to vector<4x128xf32>
    %223 = arith.mulf %222, %221 : vector<4x128xf32>
    %224 = vector.extract_strided_slice %212 {offsets = [0, 128], sizes = [4, 128], strides = [1, 1]} : vector<4x384xf32> to vector<4x128xf32>
    %225 = vector.extract_strided_slice %213 {offsets = [0, 128], sizes = [4, 128], strides = [1, 1]} : vector<4x384xf32> to vector<4x128xf32>
    %226 = arith.addf %224, %225 : vector<4x128xf32>
    %cst_66 = arith.constant 5.000000e-01 : f32
    %227 = vector.broadcast %cst_66 : f32 to vector<4x128xf32>
    %228 = arith.mulf %227, %226 : vector<4x128xf32>
    %229 = math.tanh %228 : vector<4x128xf32>
    %cst_67 = arith.constant 1.000000e+00 : f32
    %230 = vector.broadcast %cst_67 : f32 to vector<4x128xf32>
    %231 = arith.addf %229, %230 : vector<4x128xf32>
    %cst_68 = arith.constant 5.000000e-01 : f32
    %232 = vector.broadcast %cst_68 : f32 to vector<4x128xf32>
    %233 = arith.mulf %232, %231 : vector<4x128xf32>
    %234 = vector.extract_strided_slice %212 {offsets = [0, 256], sizes = [4, 128], strides = [1, 1]} : vector<4x384xf32> to vector<4x128xf32>
    %235 = vector.extract_strided_slice %213 {offsets = [0, 256], sizes = [4, 128], strides = [1, 1]} : vector<4x384xf32> to vector<4x128xf32>
    %236 = vector.broadcast %4 : vector<1x128xf32> to vector<4x128xf32>
    %237 = arith.addf %235, %236 : vector<4x128xf32>
    %238 = arith.mulf %223, %237 : vector<4x128xf32>
    %239 = arith.addf %234, %238 : vector<4x128xf32>
    %240 = math.tanh %239 : vector<4x128xf32>
    %241 = arith.subf %209, %240 : vector<4x128xf32>
    %242 = arith.mulf %233, %241 : vector<4x128xf32>
    %243 = arith.addf %240, %242 : vector<4x128xf32>
    %c7_i32 = arith.constant 7 : i32
    %244 = arith.index_cast %c7_i32 : i32 to index
    %c0_69 = arith.constant 0 : index
    %c0_70 = arith.constant 0 : index
    %245 = vector.load %arg2[%244, %c0_69, %c0_70] : memref<8x4x384xf32, #tpu.memory_space<vmem>>, vector<1x4x384xf32>
    %246 = vector.shape_cast %245 : vector<1x4x384xf32> to vector<4x384xf32>
    %cst_71 = arith.constant dense<0.000000e+00> : vector<4x384xf32>
    %247 = tpu.matmul %243, %3, %cst_71 {dimension_numbers = #tpu.dot_dimension_numbers<[1], [0], [0], [1], [0, 0, 1, 1], [], []>} : vector<4x128xf32>, vector<128x384xf32>, vector<4x384xf32> -> vector<4x384xf32>
    %248 = vector.extract_strided_slice %246 {offsets = [0, 0], sizes = [4, 128], strides = [1, 1]} : vector<4x384xf32> to vector<4x128xf32>
    %249 = vector.extract_strided_slice %247 {offsets = [0, 0], sizes = [4, 128], strides = [1, 1]} : vector<4x384xf32> to vector<4x128xf32>
    %250 = arith.addf %248, %249 : vector<4x128xf32>
    %cst_72 = arith.constant 5.000000e-01 : f32
    %251 = vector.broadcast %cst_72 : f32 to vector<4x128xf32>
    %252 = arith.mulf %251, %250 : vector<4x128xf32>
    %253 = math.tanh %252 : vector<4x128xf32>
    %cst_73 = arith.constant 1.000000e+00 : f32
    %254 = vector.broadcast %cst_73 : f32 to vector<4x128xf32>
    %255 = arith.addf %253, %254 : vector<4x128xf32>
    %cst_74 = arith.constant 5.000000e-01 : f32
    %256 = vector.broadcast %cst_74 : f32 to vector<4x128xf32>
    %257 = arith.mulf %256, %255 : vector<4x128xf32>
    %258 = vector.extract_strided_slice %246 {offsets = [0, 128], sizes = [4, 128], strides = [1, 1]} : vector<4x384xf32> to vector<4x128xf32>
    %259 = vector.extract_strided_slice %247 {offsets = [0, 128], sizes = [4, 128], strides = [1, 1]} : vector<4x384xf32> to vector<4x128xf32>
    %260 = arith.addf %258, %259 : vector<4x128xf32>
    %cst_75 = arith.constant 5.000000e-01 : f32
    %261 = vector.broadcast %cst_75 : f32 to vector<4x128xf32>
    %262 = arith.mulf %261, %260 : vector<4x128xf32>
    %263 = math.tanh %262 : vector<4x128xf32>
    %cst_76 = arith.constant 1.000000e+00 : f32
    %264 = vector.broadcast %cst_76 : f32 to vector<4x128xf32>
    %265 = arith.addf %263, %264 : vector<4x128xf32>
    %cst_77 = arith.constant 5.000000e-01 : f32
    %266 = vector.broadcast %cst_77 : f32 to vector<4x128xf32>
    %267 = arith.mulf %266, %265 : vector<4x128xf32>
    %268 = vector.extract_strided_slice %246 {offsets = [0, 256], sizes = [4, 128], strides = [1, 1]} : vector<4x384xf32> to vector<4x128xf32>
    %269 = vector.extract_strided_slice %247 {offsets = [0, 256], sizes = [4, 128], strides = [1, 1]} : vector<4x384xf32> to vector<4x128xf32>
    %270 = vector.broadcast %4 : vector<1x128xf32> to vector<4x128xf32>
    %271 = arith.addf %269, %270 : vector<4x128xf32>
    %272 = arith.mulf %257, %271 : vector<4x128xf32>
    %273 = arith.addf %268, %272 : vector<4x128xf32>
    %274 = math.tanh %273 : vector<4x128xf32>
    %275 = arith.subf %243, %274 : vector<4x128xf32>
    %276 = arith.mulf %267, %275 : vector<4x128xf32>
    %277 = arith.addf %274, %276 : vector<4x128xf32>
    %c8_i32 = arith.constant 8 : i32
    %c0_78 = arith.constant 0 : index
    %c0_79 = arith.constant 0 : index
    %278 = vector.load %arg6[%c0_78, %c0_79] : memref<4x128xf32, #tpu.memory_space<vmem>>, vector<4x128xf32>
    tpu.vector_store %arg6[%c0_78, %c0_79], %277 {strides = array<i32>} : memref<4x128xf32, #tpu.memory_space<vmem>>, vector<4x128xf32>,
    %c0_i32_80 = arith.constant 0 : i32
    %279 = arith.cmpi eq, %arg1, %c0_i32_80 : i32
    %280 = arith.extui %279 : i1 to i32
    %c0_i32_81 = arith.constant 0 : i32
    %281 = arith.cmpi ne, %280, %c0_i32_81 : i32
    scf.if %281 {
      %c0_82 = arith.constant 0 : index
      %c0_83 = arith.constant 0 : index
      %282 = vector.load %arg5[%c0_82, %c0_83] : memref<4x128xf32, #tpu.memory_space<vmem>>, vector<4x128xf32>
      tpu.vector_store %arg5[%c0_82, %c0_83], %277 {strides = array<i32>} : memref<4x128xf32, #tpu.memory_space<vmem>>, vector<4x128xf32>,
    } else {
    }
    return
  }
  func.func @transform_0(%arg0: i32, %arg1: i32) -> (i32, i32, i32) {
    %c0_i32 = arith.constant 0 : i32
    %c0_i32_0 = arith.constant 0 : i32
    return %arg1, %arg0, %c0_i32 : i32, i32, i32
  }
  func.func @transform_1(%arg0: i32, %arg1: i32) -> (i32, i32) {
    %c0_i32 = arith.constant 0 : i32
    %c0_i32_0 = arith.constant 0 : i32
    %c0_i32_1 = arith.constant 0 : i32
    return %c0_i32, %c0_i32_0 : i32, i32
  }
  func.func @transform_2(%arg0: i32, %arg1: i32) -> (i32, i32) {
    %c0_i32 = arith.constant 0 : i32
    %c0_i32_0 = arith.constant 0 : i32
    %c0_i32_1 = arith.constant 0 : i32
    return %c0_i32, %c0_i32_0 : i32, i32
  }
  func.func @transform_3(%arg0: i32, %arg1: i32) -> (i32, i32) {
    %c0_i32 = arith.constant 0 : i32
    %c0_i32_0 = arith.constant 0 : i32
    return %arg0, %c0_i32 : i32, i32
  }
}

</mosaic_0001>

<bundles_post_ra>
// kernel: _lambda_.1
= control target key start
LH: loop header
LB: loop body
LE: loop exit
PB: predicated region body
PF: predicated region fallthrough
CT: control target
= control target key end

     0   :  { %v819_v2 = vmov 0.0   ;;  %s1580_s1 = inlined_call_operand.vmem [shape: f32[128,384], index: 1, kind: input, shape index: {}]   ;;  %s1581_s2 = inlined_call_operand.vmem [shape: f32[1,128], index: 2, kind: input, shape index: {}]   ;;  %s1582_s0 = inlined_call_operand.vmem [shape: f32[8,4,384], index: 0, kind: input, shape index: {}]   ;;  %s1583_s3 = inlined_call_operand.vmem [shape: f32[4,128], index: 3, kind: output, shape index: {}]  }
   0x1   :  { %v843_v0 = vld [vmem:[%s1580_s1 + $0x168] sm:$0xff]  ;;  %v848_v1 = vld [vmem:[%s1580_s1 + $0x150] sm:$0xff]  ;;  %18 = vst [vmem:[#allocation2] sm:$0xf] %v819_v2  ;;  %v854_v3 = vld [vmem:[%s1580_s1 + $0x178] sm:$0xff] }
   0x2   :  { %71 = vmatpush.msra.mxu0 %v843_v0  ;;  %157 = vmatpush.msra.mxu3 %v843_v0  ;;  %v860_v4 = vld [vmem:[%s1580_s1 + $0x138] sm:$0xff]  ;;  %v866_v5 = vld [vmem:[%s1580_s1 + $0x160] sm:$0xff]  ;;  %v872_v6 = vld [vmem:[%s1580_s1 + $0x148] sm:$0xff] }
   0x3   :  { %111 = vmatpush.msra.mxu2 %v854_v3  ;;  %v877_v7 = vld [vmem:[%s1580_s1 + $0x170] sm:$0xff]  ;;  %v883_v8 = vld [vmem:[%s1580_s1 + $0x120] sm:$0xff]  ;;  %v890_v9 = vld [vmem:[%s1580_s1 + $0x158] sm:$0xff] }
   0x4   :  { %72 = vmatpush.msra.mxu0 %v848_v1  ;;  %158 = vmatpush.msra.mxu3 %v848_v1  ;;  %v896_v10 = vld [vmem:[%s1580_s1 + $0x130] sm:$0xff]  ;;  %v901_v11 = vld [vmem:[%s1580_s1 + $0x140] sm:$0xff]  ;;  %v907_v12 = vld [vmem:[%s1580_s1 + $0x108] sm:$0xff] }
   0x5   :  { %112 = vmatpush.msra.mxu2 %v866_v5  ;;  %91 = vmatpush.msra.mxu1 %v877_v7  ;;  %v915_v13 = vld [vmem:[%s1580_s1 + $0x118] sm:$0xff]  ;;  %v920_v14 = vld [vmem:[%s1580_s1 + $0x128] sm:$0xff]  ;;  %v926_v15 = vld [vmem:[%s1580_s1 + $0xf0] sm:$0xff] }
   0x6   :  { %73 = vmatpush.msra.mxu0 %v860_v4  ;;  %159 = vmatpush.msra.mxu3 %v860_v4  ;;  %v934_v16 = vld [vmem:[%s1580_s1 + $0x100] sm:$0xff]  ;;  %v939_v17 = vld [vmem:[%s1580_s1 + $0x110] sm:$0xff]  ;;  %v945_v18 = vld [vmem:[%s1580_s1 + $0xd8] sm:$0xff] }
   0x7   :  { %113 = vmatpush.msra.mxu2 %v872_v6  ;;  %92 = vmatpush.msra.mxu1 %v890_v9  ;;  %v953_v19 = vld [vmem:[%s1580_s1 + $0xe8] sm:$0xff]  ;;  %v958_v20 = vld [vmem:[%s1580_s1 + $0xf8] sm:$0xff]  ;;  %v964_v21 = vld [vmem:[%s1580_s1 + $0xc0] sm:$0xff] }
   0x8   :  { %74 = vmatpush.msra.mxu0 %v883_v8  ;;  %160 = vmatpush.msra.mxu3 %v883_v8  ;;  %v972_v22 = vld [vmem:[%s1580_s1 + $0xd0] sm:$0xff]  ;;  %v977_v23 = vld [vmem:[%s1580_s1 + $0xe0] sm:$0xff]  ;;  %v983_v24 = vld [vmem:[%s1580_s1 + $0xa8] sm:$0xff] }
   0x9   :  { %114 = vmatpush.msra.mxu2 %v896_v10  ;;  %93 = vmatpush.msra.mxu1 %v901_v11  ;;  %v991_v25 = vld [vmem:[%s1580_s1 + $0xb8] sm:$0xff]  ;;  %v996_v26 = vld [vmem:[%s1580_s1 + $0xc8] sm:$0xff]  ;;  %v1002_v27 = vld [vmem:[%s1580_s1 + $0x90] sm:$0xff] }
   0xa   :  { %75 = vmatpush.msra.mxu0 %v907_v12  ;;  %161 = vmatpush.msra.mxu3 %v907_v12  ;;  %v1010_v28 = vld [vmem:[%s1580_s1 + $0xa0] sm:$0xff]  ;;  %v1015_v29 = vld [vmem:[%s1580_s1 + $0xb0] sm:$0xff]  ;;  %v1021_v30 = vld [vmem:[%s1580_s1 + $0x78] sm:$0xff] }
   0xb   :  { %115 = vmatpush.msra.mxu2 %v915_v13  ;;  %94 = vmatpush.msra.mxu1 %v920_v14  ;;  %v1029_v31 = vld [vmem:[%s1580_s1 + $0x88] sm:$0xff]  ;;  %v1034_v32 = vld [vmem:[%s1580_s1 + $0x98] sm:$0xff]  ;;  %v1040_v33 = vld [vmem:[%s1580_s1 + $0x60] sm:$0xff] }
   0xc   :  { %76 = vmatpush.msra.mxu0 %v926_v15  ;;  %162 = vmatpush.msra.mxu3 %v926_v15  ;;  %v1048_v34 = vld [vmem:[%s1580_s1 + $0x70] sm:$0xff]  ;;  %v1053_v35 = vld [vmem:[%s1580_s1 + $0x80] sm:$0xff]  ;;  %v1059_v36 = vld [vmem:[%s1580_s1 + $0x48] sm:$0xff] }
   0xd   :  { %116 = vmatpush.msra.mxu2 %v934_v16  ;;  %95 = vmatpush.msra.mxu1 %v939_v17  ;;  %v1067_v37 = vld [vmem:[%s1580_s1 + $0x58] sm:$0xff]  ;;  %v1072_v38 = vld [vmem:[%s1580_s1 + $0x68] sm:$0xff]  ;;  %v1078_v39 = vld [vmem:[%s1580_s1 + $0x30] sm:$0xff] }
   0xe   :  { %77 = vmatpush.msra.mxu0 %v945_v18  ;;  %163 = vmatpush.msra.mxu3 %v945_v18  ;;  %v1086_v40 = vld [vmem:[%s1580_s1 + $0x40] sm:$0xff]  ;;  %v1091_v41 = vld [vmem:[%s1580_s1 + $0x50] sm:$0xff]  ;;  %v1097_v42 = vld [vmem:[%s1580_s1 + $0x18] sm:$0xff] }
   0xf   :  { %117 = vmatpush.msra.mxu2 %v953_v19  ;;  %96 = vmatpush.msra.mxu1 %v958_v20  ;;  %v1105_v43 = vld [vmem:[%s1580_s1 + $0x28] sm:$0xff]  ;;  %v1110_v44 = vld [vmem:[%s1580_s1 + $0x38] sm:$0xff]  ;;  %v1116_v45 = vld [vmem:[%s1580_s1] sm:$0xff] }
  0x10   :  { %78 = vmatpush.msra.mxu0 %v964_v21  ;;  %164 = vmatpush.msra.mxu3 %v964_v21  ;;  %1588 = vst [vmem:[#allocation3_spill] sm:$0xff] %v1116_v45  ;;  %v1121_v46 = vld [vmem:[#allocation2] sm:$0xf]  ;;  %v1126_v47 = vld [vmem:[%s1580_s1 + $0x10] sm:$0xff]  ;;  %v1143_v49 = vld [vmem:[%s1580_s1 + $0x8] sm:$0xff] }
  0x11   :  { %118 = vmatpush.msra.mxu2 %v972_v22  ;;  %97 = vmatpush.msra.mxu1 %v977_v23  ;;  %v1134_v48 = vld [vmem:[%s1580_s1 + $0x20] sm:$0xff]  ;;  %1589 = vst [vmem:[#allocation4_spill] sm:$0xff] %v1143_v49  ;;  %v70_v2 = vld [vmem:[%s1582_s0 + $0x8] sm:$0xf] }
  0x12   :  { %79 = vmatpush.msra.mxu0 %v983_v24  ;;  %165 = vmatpush.msra.mxu3 %v983_v24  ;;  %v69_v50 = vld [vmem:[%s1582_s0] sm:$0xff] }
  0x13   :  { %119 = vmatpush.msra.mxu2 %v991_v25  ;;  %98 = vmatpush.msra.mxu1 %v996_v26  ;;  %v137_v53 = vrot.slane %v69_v50, 4  ;;  %v1267_v58 = vld [vmem:[%s1581_s2] ss:$0 sm:$0xff] }
  0x14   :  { %80 = vmatpush.msra.mxu0 %v1002_v27  ;;  %166 = vmatpush.msra.mxu3 %v1002_v27 }
  0x15   :  { %120 = vmatpush.msra.mxu2 %v1010_v28  ;;  %99 = vmatpush.msra.mxu1 %v1015_v29 }
  0x16   :  { %81 = vmatpush.msra.mxu0 %v1021_v30  ;;  %167 = vmatpush.msra.mxu3 %v1021_v30 }
  0x17   :  { %121 = vmatpush.msra.mxu2 %v1029_v31  ;;  %100 = vmatpush.msra.mxu1 %v1034_v32 }
  0x18   :  { %82 = vmatpush.msra.mxu0 %v1040_v33  ;;  %168 = vmatpush.msra.mxu3 %v1040_v33 }
  0x19   :  { %122 = vmatpush.msra.mxu2 %v1048_v34  ;;  %101 = vmatpush.msra.mxu1 %v1053_v35 }
  0x1a   :  { %83 = vmatpush.msra.mxu0 %v1059_v36  ;;  %169 = vmatpush.msra.mxu3 %v1059_v36 }
  0x1b   :  { %123 = vmatpush.msra.mxu2 %v1067_v37  ;;  %102 = vmatpush.msra.mxu1 %v1072_v38 }
  0x1c   :  { %84 = vmatpush.msra.mxu0 %v1078_v39  ;;  %170 = vmatpush.msra.mxu3 %v1078_v39 }
  0x1d   :  { %124 = vmatpush.msra.mxu2 %v1086_v40  ;;  %103 = vmatpush.msra.mxu1 %v1091_v41 }
  0x1e   :  { %85 = vmatpush.msra.mxu0 %v1097_v42  ;;  %171 = vmatpush.msra.mxu3 %v1097_v42 }
  0x1f   :  { %125 = vmatpush.msra.mxu2 %v1105_v43  ;;  %104 = vmatpush.msra.mxu1 %v1110_v44 }
  0x20   :  { %86 = vmatpush.msra.mxu0 %v1116_v45  ;;  %172 = vmatpush.msra.mxu3 %v1116_v45 }
  0x21   :  { %87 = vmatmul.f32.vlgmr.msra.gmra.mxu0 %v1121_v46  ;;  %126 = vmatpush.msra.mxu2 %v1126_v47 }
  0x22   :  { %127 = vmatmul.f32.vlgmr.msra.gmra.mxu2 %v1121_v46  ;;  %105 = vmatpush.msra.mxu1 %v1134_v48 }
  0x23   :  { %177 = vmatpush.msrb.mxu0 %v877_v7  ;;  %240 = vmatpush.msrb.mxu2 %v843_v0 }
  0x24   :  { %106 = vmatpush.msra.mxu1 %v1143_v49  ;;  %260 = vmatpush.msrb.mxu3 %v877_v7 }
  0x25   :  { %107 = vmatmul.f32.vlgmr.msra.gmra.mxu1 %v1121_v46  ;;  %178 = vmatpush.msrb.mxu0 %v890_v9 }
  0x26   :  { %197 = vmatpush.msrb.mxu1 %v854_v3  ;;  %241 = vmatpush.msrb.mxu2 %v848_v1 }
  0x27   :  { %179 = vmatpush.msrb.mxu0 %v901_v11  ;;  %261 = vmatpush.msrb.mxu3 %v890_v9 }
  0x28   :  { %198 = vmatpush.msrb.mxu1 %v866_v5  ;;  %242 = vmatpush.msrb.mxu2 %v860_v4 }
  0x29   :  { %180 = vmatpush.msrb.mxu0 %v920_v14  ;;  %262 = vmatpush.msrb.mxu3 %v901_v11 }
  0x2a   :  { %199 = vmatpush.msrb.mxu1 %v872_v6  ;;  %243 = vmatpush.msrb.mxu2 %v883_v8 }
  0x2b   :  { %181 = vmatpush.msrb.mxu0 %v939_v17  ;;  %263 = vmatpush.msrb.mxu3 %v920_v14 }
  0x2c   :  { %200 = vmatpush.msrb.mxu1 %v896_v10  ;;  %244 = vmatpush.msrb.mxu2 %v907_v12 }
  0x2d   :  { %182 = vmatpush.msrb.mxu0 %v958_v20  ;;  %264 = vmatpush.msrb.mxu3 %v939_v17 }
  0x2e   :  { %201 = vmatpush.msrb.mxu1 %v915_v13  ;;  %245 = vmatpush.msrb.mxu2 %v926_v15 }
  0x2f   :  { %183 = vmatpush.msrb.mxu0 %v977_v23  ;;  %265 = vmatpush.msrb.mxu3 %v958_v20 }
  0x30   :  { %202 = vmatpush.msrb.mxu1 %v934_v16  ;;  %246 = vmatpush.msrb.mxu2 %v945_v18 }
  0x31   :  { %184 = vmatpush.msrb.mxu0 %v996_v26  ;;  %266 = vmatpush.msrb.mxu3 %v977_v23 }
  0x32   :  { %203 = vmatpush.msrb.mxu1 %v953_v19  ;;  %247 = vmatpush.msrb.mxu2 %v964_v21 }
  0x33   :  { %185 = vmatpush.msrb.mxu0 %v1015_v29  ;;  %267 = vmatpush.msrb.mxu3 %v996_v26 }
  0x34   :  { %204 = vmatpush.msrb.mxu1 %v972_v22  ;;  %248 = vmatpush.msrb.mxu2 %v983_v24 }
  0x35   :  { %186 = vmatpush.msrb.mxu0 %v1034_v32  ;;  %268 = vmatpush.msrb.mxu3 %v1015_v29 }
  0x36   :  { %205 = vmatpush.msrb.mxu1 %v991_v25  ;;  %249 = vmatpush.msrb.mxu2 %v1002_v27 }
  0x37   :  { %187 = vmatpush.msrb.mxu0 %v1053_v35  ;;  %269 = vmatpush.msrb.mxu3 %v1034_v32 }
  0x38   :  { %206 = vmatpush.msrb.mxu1 %v1010_v28  ;;  %250 = vmatpush.msrb.mxu2 %v1021_v30 }
  0x39   :  { %188 = vmatpush.msrb.mxu0 %v1072_v38  ;;  %270 = vmatpush.msrb.mxu3 %v1053_v35 }
  0x3a   :  { %207 = vmatpush.msrb.mxu1 %v1029_v31  ;;  %251 = vmatpush.msrb.mxu2 %v1040_v33 }
  0x3b   :  { %189 = vmatpush.msrb.mxu0 %v1091_v41  ;;  %271 = vmatpush.msrb.mxu3 %v1072_v38 }
  0x3c   :  { %208 = vmatpush.msrb.mxu1 %v1048_v34  ;;  %252 = vmatpush.msrb.mxu2 %v1059_v36 }
  0x3d   :  { %190 = vmatpush.msrb.mxu0 %v1110_v44  ;;  %272 = vmatpush.msrb.mxu3 %v1091_v41 }
  0x3e   :  { %209 = vmatpush.msrb.mxu1 %v1067_v37  ;;  %253 = vmatpush.msrb.mxu2 %v1078_v39 }
  0x3f   :  { %191 = vmatpush.msrb.mxu0 %v1134_v48  ;;  %273 = vmatpush.msrb.mxu3 %v1110_v44 }
  0x40   :  { %210 = vmatpush.msrb.mxu1 %v1086_v40  ;;  %254 = vmatpush.msrb.mxu2 %v1097_v42 }
  0x41   :  { %192 = vmatpush.msrb.mxu0 %v1143_v49  ;;  %274 = vmatpush.msrb.mxu3 %v1134_v48 }
  0x42   :  { %211 = vmatpush.msrb.mxu1 %v1105_v43  ;;  %255 = vmatpush.msrb.mxu2 %v1116_v45 }
  0x43   :  { %280 = vmatpush.msra.mxu0 %v854_v3  ;;  %275 = vmatpush.msrb.mxu3 %v1143_v49 }
  0x44   :  { %212 = vmatpush.msrb.mxu1 %v1126_v47  ;;  %343 = vmatpush.msra.mxu2 %v877_v7 }
  0x45   :  { %281 = vmatpush.msra.mxu0 %v866_v5 }
  0x46   :  { %323 = vmatpush.msra.mxu1 %v843_v0  ;;  %344 = vmatpush.msra.mxu2 %v890_v9 }
  0x47   :  { %282 = vmatpush.msra.mxu0 %v872_v6 }
  0x48   :  { %324 = vmatpush.msra.mxu1 %v848_v1  ;;  %345 = vmatpush.msra.mxu2 %v901_v11 }
  0x49   :  { %283 = vmatpush.msra.mxu0 %v896_v10 }
  0x4a   :  { %325 = vmatpush.msra.mxu1 %v860_v4  ;;  %346 = vmatpush.msra.mxu2 %v920_v14 }
  0x4b   :  { %284 = vmatpush.msra.mxu0 %v915_v13 }
  0x4c   :  { %326 = vmatpush.msra.mxu1 %v883_v8  ;;  %347 = vmatpush.msra.mxu2 %v939_v17 }
  0x4d   :  { %285 = vmatpush.msra.mxu0 %v934_v16 }
  0x4e   :  { %327 = vmatpush.msra.mxu1 %v907_v12  ;;  %348 = vmatpush.msra.mxu2 %v958_v20 }
  0x4f   :  { %286 = vmatpush.msra.mxu0 %v953_v19 }
  0x50   :  { %328 = vmatpush.msra.mxu1 %v926_v15  ;;  %349 = vmatpush.msra.mxu2 %v977_v23 }
  0x51   :  { %287 = vmatpush.msra.mxu0 %v972_v22 }
  0x52   :  { %329 = vmatpush.msra.mxu1 %v945_v18  ;;  %350 = vmatpush.msra.mxu2 %v996_v26 }
  0x53   :  { %288 = vmatpush.msra.mxu0 %v991_v25 }
  0x54   :  { %330 = vmatpush.msra.mxu1 %v964_v21  ;;  %351 = vmatpush.msra.mxu2 %v1015_v29 }
  0x55   :  { %289 = vmatpush.msra.mxu0 %v1010_v28 }
  0x56   :  { %331 = vmatpush.msra.mxu1 %v983_v24  ;;  %352 = vmatpush.msra.mxu2 %v1034_v32 }
  0x57   :  { %290 = vmatpush.msra.mxu0 %v1029_v31 }
  0x58   :  { %332 = vmatpush.msra.mxu1 %v1002_v27  ;;  %353 = vmatpush.msra.mxu2 %v1053_v35 }
  0x59   :  { %291 = vmatpush.msra.mxu0 %v1048_v34 }
  0x5a   :  { %333 = vmatpush.msra.mxu1 %v1021_v30  ;;  %354 = vmatpush.msra.mxu2 %v1072_v38 }
  0x5b   :  { %292 = vmatpush.msra.mxu0 %v1067_v37 }
  0x5c   :  { %334 = vmatpush.msra.mxu1 %v1040_v33  ;;  %355 = vmatpush.msra.mxu2 %v1091_v41 }
  0x5d   :  { %293 = vmatpush.msra.mxu0 %v1086_v40 }
  0x5e   :  { %335 = vmatpush.msra.mxu1 %v1059_v36  ;;  %356 = vmatpush.msra.mxu2 %v1110_v44 }
  0x5f   :  { %294 = vmatpush.msra.mxu0 %v1105_v43 }
  0x60   :  { %336 = vmatpush.msra.mxu1 %v1078_v39  ;;  %357 = vmatpush.msra.mxu2 %v1134_v48 }
  0x61   :  { %295 = vmatpush.msra.mxu0 %v1126_v47 }
  0x62   :  { %337 = vmatpush.msra.mxu1 %v1097_v42  ;;  %358 = vmatpush.msra.mxu2 %v1143_v49 }
  0x64   :  { %338 = vmatpush.msra.mxu1 %v1116_v45 }
  0x9e   :  { %v88_v51 = vpop.f32.mrf.mxu0 }
  0x9f   :  { %v131_v52 = vadd.f32 %v88_v51, %v69_v50 }
  0xa1   :  { %v132_v54 = vmul.f32 0.5, %v131_v52 }
  0xa2   :  { %v108_v55 = vpop.f32.mrf.mxu1 }
  0xa3   :  { %760 = vtanh.f32 %v132_v54  ;;  %v139_v56 = vadd.f32 %v137_v53, %v108_v55 }
  0xa5   :  { %v140_v57 = vmul.f32 0.5, %v139_v56  ;;  %v128_v59 = vpop.f32.mrf.mxu2 }
  0xa6   :  { %v147_v62 = vadd.f32 %v1267_v58, %v128_v59 }
  0xa7   :  { %762 = vtanh.f32 %v140_v57  ;;  %v744_v57 = vld [vmem:[%s1582_s0 + $0xc] sm:$0xff] }
  0xa9   :  { %v761_v60 = vpop.eup %760 }
  0xaa   :  { %v134_v61 = vadd.f32 1.0, %v761_v60 }
  0xac   :  { %v135_v63 = vmul.f32 0.5, %v134_v61  ;;  %v223_v61 = vrot.slane %v744_v57, 4 }
  0xad   :  { %v763_v51 = vpop.eup %762 }
  0xae   :  { %v148_v50 = vmul.f32 %v147_v62, %v135_v63  ;;  %v142_v53 = vadd.f32 1.0, %v763_v51 }
  0xb0   :  { %v149_v52 = vadd.f32 %v148_v50, %v70_v2  ;;  %v143_v54 = vmul.f32 0.5, %v142_v53 }
  0xb2   :  { %764 = vtanh.f32 %v149_v52 }
  0xb8   :  { %v765_v55 = vpop.eup %764 }
  0xb9   :  { %v151_v56 = vsub.f32 %v1121_v46, %v765_v55  ;;  %v1590_v46 = vld [vmem:[#allocation3_spill] sm:$0xff] }
  0xbb   :  { %v152_v49 = vmul.f32 %v151_v56, %v143_v54  ;;  %v745_v56 = vld [vmem:[%s1582_s0 + $0x14] sm:$0xf] }
  0xbd   :  { %v1274_v45 = vadd.f32 %v765_v55, %v152_v49  ;;  %v1591_v49 = vld [vmem:[#allocation4_spill] sm:$0xff] }
  0xbf   :  { %173 = vmatmul.f32.vlgmr.msra.gmra.mxu3 %v1274_v45  ;;  %193 = vmatmul.f32.vlgmr.msrb.gmra.mxu0 %v1274_v45 }
  0xc0   :  { %213 = vmatmul.f32.vlgmr.msrb.gmra.mxu1 %v1274_v45  ;;  %363 = vmatpush.msra.mxu3 %v854_v3 }
  0xc1   :  { %406 = vmatpush.msrb.mxu0 %v843_v0  ;;  %426 = vmatpush.msrb.mxu1 %v877_v7 }
  0xc2   :  { %364 = vmatpush.msra.mxu3 %v866_v5 }
  0xc3   :  { %407 = vmatpush.msrb.mxu0 %v848_v1  ;;  %427 = vmatpush.msrb.mxu1 %v890_v9 }
  0xc4   :  { %365 = vmatpush.msra.mxu3 %v872_v6 }
  0xc5   :  { %408 = vmatpush.msrb.mxu0 %v860_v4  ;;  %428 = vmatpush.msrb.mxu1 %v901_v11 }
  0xc6   :  { %366 = vmatpush.msra.mxu3 %v896_v10 }
  0xc7   :  { %409 = vmatpush.msrb.mxu0 %v883_v8  ;;  %429 = vmatpush.msrb.mxu1 %v920_v14 }
  0xc8   :  { %367 = vmatpush.msra.mxu3 %v915_v13 }
  0xc9   :  { %410 = vmatpush.msrb.mxu0 %v907_v12  ;;  %430 = vmatpush.msrb.mxu1 %v939_v17 }
  0xca   :  { %368 = vmatpush.msra.mxu3 %v934_v16 }
  0xcb   :  { %411 = vmatpush.msrb.mxu0 %v926_v15  ;;  %431 = vmatpush.msrb.mxu1 %v958_v20 }
  0xcc   :  { %369 = vmatpush.msra.mxu3 %v953_v19 }
  0xcd   :  { %412 = vmatpush.msrb.mxu0 %v945_v18  ;;  %432 = vmatpush.msrb.mxu1 %v977_v23 }
  0xce   :  { %370 = vmatpush.msra.mxu3 %v972_v22 }
  0xcf   :  { %413 = vmatpush.msrb.mxu0 %v964_v21  ;;  %433 = vmatpush.msrb.mxu1 %v996_v26 }
  0xd0   :  { %371 = vmatpush.msra.mxu3 %v991_v25 }
  0xd1   :  { %414 = vmatpush.msrb.mxu0 %v983_v24  ;;  %434 = vmatpush.msrb.mxu1 %v1015_v29 }
  0xd2   :  { %372 = vmatpush.msra.mxu3 %v1010_v28 }
  0xd3   :  { %415 = vmatpush.msrb.mxu0 %v1002_v27  ;;  %435 = vmatpush.msrb.mxu1 %v1034_v32 }
  0xd4   :  { %373 = vmatpush.msra.mxu3 %v1029_v31 }
  0xd5   :  { %416 = vmatpush.msrb.mxu0 %v1021_v30  ;;  %436 = vmatpush.msrb.mxu1 %v1053_v35 }
  0xd6   :  { %374 = vmatpush.msra.mxu3 %v1048_v34 }
  0xd7   :  { %417 = vmatpush.msrb.mxu0 %v1040_v33  ;;  %437 = vmatpush.msrb.mxu1 %v1072_v38 }
  0xd8   :  { %375 = vmatpush.msra.mxu3 %v1067_v37 }
  0xd9   :  { %418 = vmatpush.msrb.mxu0 %v1059_v36  ;;  %438 = vmatpush.msrb.mxu1 %v1091_v41 }
  0xda   :  { %376 = vmatpush.msra.mxu3 %v1086_v40 }
  0xdb   :  { %419 = vmatpush.msrb.mxu0 %v1078_v39  ;;  %439 = vmatpush.msrb.mxu1 %v1110_v44 }
  0xdc   :  { %377 = vmatpush.msra.mxu3 %v1105_v43 }
  0xdd   :  { %420 = vmatpush.msrb.mxu0 %v1097_v42  ;;  %440 = vmatpush.msrb.mxu1 %v1134_v48 }
  0xde   :  { %378 = vmatpush.msra.mxu3 %v1126_v47 }
  0xdf   :  { %421 = vmatpush.msrb.mxu0 %v1590_v46  ;;  %441 = vmatpush.msrb.mxu1 %v1591_v49 }
 0x13c   :  { %v194_v62 = vpop.f32.mrf.mxu0 }
 0x13d   :  { %v225_v2 = vadd.f32 %v223_v61, %v194_v62  ;;  %v214_v52 = vpop.f32.mrf.mxu1 }
 0x13e   :  { %v230_v54 = vadd.f32 %v1267_v58, %v214_v52 }
 0x13f   :  { %v226_v50 = vmul.f32 0.5, %v225_v2 }
 0x142   :  { %v174_v59 = vpop.f32.mrf.mxu3 }
 0x143   :  { %v217_v60 = vadd.f32 %v744_v57, %v174_v59 }
 0x145   :  { %v218_v63 = vmul.f32 0.5, %v217_v60 }
 0x147   :  { %766 = vtanh.f32 %v218_v63 }
 0x148   :  { %768 = vtanh.f32 %v226_v50 }
 0x14d   :  { %v767_v51 = vpop.eup %766 }
 0x14e   :  { %v220_v53 = vadd.f32 1.0, %v767_v51  ;;  %v769_v59 = vpop.eup %768 }
 0x14f   :  { %v228_v57 = vadd.f32 1.0, %v769_v59 }
 0x150   :  { %v221_v55 = vmul.f32 0.5, %v220_v53 }
 0x151   :  { %v229_v63 = vmul.f32 0.5, %v228_v57 }
 0x152   :  { %v231_v49 = vmul.f32 %v230_v54, %v221_v55 }
 0x154   :  { %v232_v46 = vadd.f32 %v745_v56, %v231_v49  ;;  %v746_v49 = vld [vmem:[%s1582_s0 + $0x18] sm:$0xff] }
 0x155   :  { %v306_v52 = vrot.slane %v746_v49, 4 }
 0x156   :  { %770 = vtanh.f32 %v232_v46  ;;  %v1593_v46 = vld [vmem:[#allocation4_spill] sm:$0xff] }
 0x15c   :  { %v771_v60 = vpop.eup %770 }
 0x15d   :  { %v234_v61 = vsub.f32 %v1274_v45, %v771_v60  ;;  %v1592_v45 = vld [vmem:[#allocation3_spill] sm:$0xff] }
 0x15f   :  { %v235_v62 = vmul.f32 %v234_v61, %v229_v63 }
 0x161   :  { %v1335_v2 = vadd.f32 %v771_v60, %v235_v62  ;;  %v747_v62 = vld [vmem:[%s1582_s0 + $0x20] sm:$0xf] }
 0x163   :  { %256 = vmatmul.f32.vlgmr.msrb.gmra.mxu2 %v1335_v2  ;;  %276 = vmatmul.f32.vlgmr.msrb.gmra.mxu3 %v1335_v2 }
 0x164   :  { %296 = vmatmul.f32.vlgmr.msra.gmra.mxu0 %v1335_v2  ;;  %446 = vmatpush.msrb.mxu2 %v854_v3 }
 0x165   :  { %489 = vmatpush.msrb.mxu3 %v843_v0  ;;  %509 = vmatpush.msra.mxu0 %v877_v7 }
 0x166   :  { %447 = vmatpush.msrb.mxu2 %v866_v5 }
 0x167   :  { %490 = vmatpush.msrb.mxu3 %v848_v1  ;;  %510 = vmatpush.msra.mxu0 %v890_v9 }
 0x168   :  { %448 = vmatpush.msrb.mxu2 %v872_v6 }
 0x169   :  { %491 = vmatpush.msrb.mxu3 %v860_v4  ;;  %511 = vmatpush.msra.mxu0 %v901_v11 }
 0x16a   :  { %449 = vmatpush.msrb.mxu2 %v896_v10 }
 0x16b   :  { %492 = vmatpush.msrb.mxu3 %v883_v8  ;;  %512 = vmatpush.msra.mxu0 %v920_v14 }
 0x16c   :  { %450 = vmatpush.msrb.mxu2 %v915_v13 }
 0x16d   :  { %493 = vmatpush.msrb.mxu3 %v907_v12  ;;  %513 = vmatpush.msra.mxu0 %v939_v17 }
 0x16e   :  { %451 = vmatpush.msrb.mxu2 %v934_v16 }
 0x16f   :  { %494 = vmatpush.msrb.mxu3 %v926_v15  ;;  %514 = vmatpush.msra.mxu0 %v958_v20 }
 0x170   :  { %452 = vmatpush.msrb.mxu2 %v953_v19 }
 0x171   :  { %495 = vmatpush.msrb.mxu3 %v945_v18  ;;  %515 = vmatpush.msra.mxu0 %v977_v23 }
 0x172   :  { %453 = vmatpush.msrb.mxu2 %v972_v22 }
 0x173   :  { %496 = vmatpush.msrb.mxu3 %v964_v21  ;;  %516 = vmatpush.msra.mxu0 %v996_v26 }
 0x174   :  { %454 = vmatpush.msrb.mxu2 %v991_v25 }
 0x175   :  { %497 = vmatpush.msrb.mxu3 %v983_v24  ;;  %517 = vmatpush.msra.mxu0 %v1015_v29 }
 0x176   :  { %455 = vmatpush.msrb.mxu2 %v1010_v28 }
 0x177   :  { %498 = vmatpush.msrb.mxu3 %v1002_v27  ;;  %518 = vmatpush.msra.mxu0 %v1034_v32 }
 0x178   :  { %456 = vmatpush.msrb.mxu2 %v1029_v31 }
 0x179   :  { %499 = vmatpush.msrb.mxu3 %v1021_v30  ;;  %519 = vmatpush.msra.mxu0 %v1053_v35 }
 0x17a   :  { %457 = vmatpush.msrb.mxu2 %v1048_v34 }
 0x17b   :  { %500 = vmatpush.msrb.mxu3 %v1040_v33  ;;  %520 = vmatpush.msra.mxu0 %v1072_v38 }
 0x17c   :  { %458 = vmatpush.msrb.mxu2 %v1067_v37 }
 0x17d   :  { %501 = vmatpush.msrb.mxu3 %v1059_v36  ;;  %521 = vmatpush.msra.mxu0 %v1091_v41 }
 0x17e   :  { %459 = vmatpush.msrb.mxu2 %v1086_v40 }
 0x17f   :  { %502 = vmatpush.msrb.mxu3 %v1078_v39  ;;  %522 = vmatpush.msra.mxu0 %v1110_v44 }
 0x180   :  { %460 = vmatpush.msrb.mxu2 %v1105_v43 }
 0x181   :  { %503 = vmatpush.msrb.mxu3 %v1097_v42  ;;  %523 = vmatpush.msra.mxu0 %v1134_v48 }
 0x182   :  { %461 = vmatpush.msrb.mxu2 %v1126_v47 }
 0x183   :  { %504 = vmatpush.msrb.mxu3 %v1592_v45  ;;  %524 = vmatpush.msra.mxu0 %v1593_v46 }
 0x1e1   :  { %v297_v57 = vpop.f32.mrf.mxu0 }
 0x1e2   :  { %v313_v63 = vadd.f32 %v1267_v58, %v297_v57 }
 0x1e6   :  { %v257_v50 = vpop.f32.mrf.mxu2  ;;  %v277_v54 = vpop.f32.mrf.mxu3 }
 0x1e7   :  { %v300_v51 = vadd.f32 %v746_v49, %v257_v50  ;;  %v308_v55 = vadd.f32 %v306_v52, %v277_v54 }
 0x1e9   :  { %v301_v53 = vmul.f32 0.5, %v300_v51  ;;  %v309_v56 = vmul.f32 0.5, %v308_v55 }
 0x1eb   :  { %772 = vtanh.f32 %v301_v53 }
 0x1ec   :  { %774 = vtanh.f32 %v309_v56 }
 0x1f1   :  { %v773_v59 = vpop.eup %772 }
 0x1f2   :  { %v303_v60 = vadd.f32 1.0, %v773_v59  ;;  %v775_v50 = vpop.eup %774 }
 0x1f3   :  { %v311_v49 = vadd.f32 1.0, %v775_v50 }
 0x1f4   :  { %v304_v61 = vmul.f32 0.5, %v303_v60 }
 0x1f5   :  { %v312_v53 = vmul.f32 0.5, %v311_v49 }
 0x1f6   :  { %v314_v46 = vmul.f32 %v313_v63, %v304_v61 }
 0x1f8   :  { %v315_v45 = vadd.f32 %v747_v62, %v314_v46  ;;  %v748_v46 = vld [vmem:[%s1582_s0 + $0x24] sm:$0xff] }
 0x1f9   :  { %v389_v60 = vrot.slane %v748_v46, 4 }
 0x1fa   :  { %776 = vtanh.f32 %v315_v45  ;;  %v1595_v45 = vld [vmem:[#allocation4_spill] sm:$0xff] }
 0x200   :  { %v777_v51 = vpop.eup %776 }
 0x201   :  { %v317_v52 = vsub.f32 %v1335_v2, %v777_v51  ;;  %v1594_v2 = vld [vmem:[#allocation3_spill] sm:$0xff] }
 0x203   :  { %v318_v54 = vmul.f32 %v317_v52, %v312_v53 }
 0x205   :  { %v1396_v55 = vadd.f32 %v777_v51, %v318_v54  ;;  %v749_v54 = vld [vmem:[%s1582_s0 + $0x2c] sm:$0xf] }
 0x207   :  { %339 = vmatmul.f32.vlgmr.msra.gmra.mxu1 %v1396_v55  ;;  %359 = vmatmul.f32.vlgmr.msra.gmra.mxu2 %v1396_v55 }
 0x208   :  { %379 = vmatmul.f32.vlgmr.msra.gmra.mxu3 %v1396_v55  ;;  %529 = vmatpush.msra.mxu1 %v854_v3 }
 0x209   :  { %572 = vmatpush.msra.mxu2 %v843_v0  ;;  %592 = vmatpush.msra.mxu3 %v877_v7 }
 0x20a   :  { %530 = vmatpush.msra.mxu1 %v866_v5 }
 0x20b   :  { %573 = vmatpush.msra.mxu2 %v848_v1  ;;  %593 = vmatpush.msra.mxu3 %v890_v9 }
 0x20c   :  { %531 = vmatpush.msra.mxu1 %v872_v6 }
 0x20d   :  { %574 = vmatpush.msra.mxu2 %v860_v4  ;;  %594 = vmatpush.msra.mxu3 %v901_v11 }
 0x20e   :  { %532 = vmatpush.msra.mxu1 %v896_v10 }
 0x20f   :  { %575 = vmatpush.msra.mxu2 %v883_v8  ;;  %595 = vmatpush.msra.mxu3 %v920_v14 }
 0x210   :  { %533 = vmatpush.msra.mxu1 %v915_v13 }
 0x211   :  { %576 = vmatpush.msra.mxu2 %v907_v12  ;;  %596 = vmatpush.msra.mxu3 %v939_v17 }
 0x212   :  { %534 = vmatpush.msra.mxu1 %v934_v16 }
 0x213   :  { %577 = vmatpush.msra.mxu2 %v926_v15  ;;  %597 = vmatpush.msra.mxu3 %v958_v20 }
 0x214   :  { %535 = vmatpush.msra.mxu1 %v953_v19 }
 0x215   :  { %578 = vmatpush.msra.mxu2 %v945_v18  ;;  %598 = vmatpush.msra.mxu3 %v977_v23 }
 0x216   :  { %536 = vmatpush.msra.mxu1 %v972_v22 }
 0x217   :  { %579 = vmatpush.msra.mxu2 %v964_v21  ;;  %599 = vmatpush.msra.mxu3 %v996_v26 }
 0x218   :  { %537 = vmatpush.msra.mxu1 %v991_v25 }
 0x219   :  { %580 = vmatpush.msra.mxu2 %v983_v24  ;;  %600 = vmatpush.msra.mxu3 %v1015_v29 }
 0x21a   :  { %538 = vmatpush.msra.mxu1 %v1010_v28 }
 0x21b   :  { %581 = vmatpush.msra.mxu2 %v1002_v27  ;;  %601 = vmatpush.msra.mxu3 %v1034_v32 }
 0x21c   :  { %539 = vmatpush.msra.mxu1 %v1029_v31 }
 0x21d   :  { %582 = vmatpush.msra.mxu2 %v1021_v30  ;;  %602 = vmatpush.msra.mxu3 %v1053_v35 }
 0x21e   :  { %540 = vmatpush.msra.mxu1 %v1048_v34 }
 0x21f   :  { %583 = vmatpush.msra.mxu2 %v1040_v33  ;;  %603 = vmatpush.msra.mxu3 %v1072_v38 }
 0x220   :  { %541 = vmatpush.msra.mxu1 %v1067_v37 }
 0x221   :  { %584 = vmatpush.msra.mxu2 %v1059_v36  ;;  %604 = vmatpush.msra.mxu3 %v1091_v41 }
 0x222   :  { %542 = vmatpush.msra.mxu1 %v1086_v40 }
 0x223   :  { %585 = vmatpush.msra.mxu2 %v1078_v39  ;;  %605 = vmatpush.msra.mxu3 %v1110_v44 }
 0x224   :  { %543 = vmatpush.msra.mxu1 %v1105_v43 }
 0x225   :  { %586 = vmatpush.msra.mxu2 %v1097_v42  ;;  %606 = vmatpush.msra.mxu3 %v1134_v48 }
 0x226   :  { %544 = vmatpush.msra.mxu1 %v1126_v47 }
 0x227   :  { %587 = vmatpush.msra.mxu2 %v1594_v2  ;;  %607 = vmatpush.msra.mxu3 %v1595_v45 }
 0x284   :  { %v340_v56 = vpop.f32.mrf.mxu1 }
 0x285   :  { %v383_v59 = vadd.f32 %v748_v46, %v340_v56 }
 0x287   :  { %v384_v57 = vmul.f32 0.5, %v383_v59 }
 0x289   :  { %778 = vtanh.f32 %v384_v57 }
 0x28a   :  { %v360_v63 = vpop.f32.mrf.mxu2 }
 0x28b   :  { %v391_v61 = vadd.f32 %v389_v60, %v360_v63  ;;  %v380_v49 = vpop.f32.mrf.mxu3 }
 0x28c   :  { %v396_v52 = vadd.f32 %v1267_v58, %v380_v49 }
 0x28d   :  { %v392_v62 = vmul.f32 0.5, %v391_v61 }
 0x28f   :  { %v779_v50 = vpop.eup %778  ;;  %780 = vtanh.f32 %v392_v62 }
 0x290   :  { %v386_v51 = vadd.f32 1.0, %v779_v50 }
 0x292   :  { %v387_v53 = vmul.f32 0.5, %v386_v51 }
 0x294   :  { %v397_v45 = vmul.f32 %v396_v52, %v387_v53 }
 0x295   :  { %v781_v56 = vpop.eup %780 }
 0x296   :  { %v398_v2 = vadd.f32 %v749_v54, %v397_v45  ;;  %v394_v46 = vadd.f32 1.0, %v781_v56 }
 0x298   :  { %782 = vtanh.f32 %v398_v2  ;;  %v395_v57 = vmul.f32 0.5, %v394_v46 }
 0x29e   :  { %v783_v59 = vpop.eup %782 }
 0x29f   :  { %v400_v60 = vsub.f32 %v1396_v55, %v783_v59 }
 0x2a1   :  { %v401_v63 = vmul.f32 %v400_v60, %v395_v57  ;;  %v754_v57 = vld [vmem:[%s1582_s0 + $0x48] sm:$0xff] }
 0x2a3   :  { %v1457_v61 = vadd.f32 %v783_v59, %v401_v63 }
 0x2a5   :  { %422 = vmatmul.f32.vlgmr.msrb.gmra.mxu0 %v1457_v61  ;;  %442 = vmatmul.f32.vlgmr.msrb.gmra.mxu1 %v1457_v61 }
 0x2a6   :  { %462 = vmatmul.f32.vlgmr.msrb.gmra.mxu2 %v1457_v61  ;;  %612 = vmatpush.msrb.mxu0 %v854_v3  ;;  %v750_v3 = vld [vmem:[%s1582_s0 + $0x30] sm:$0xff] }
 0x2a7   :  { %655 = vmatpush.msrb.mxu1 %v843_v0  ;;  %675 = vmatpush.msrb.mxu2 %v877_v7  ;;  %v1596_v0 = vld [vmem:[#allocation3_spill] sm:$0xff] }
 0x2a8   :  { %613 = vmatpush.msrb.mxu0 %v866_v5 }
 0x2a9   :  { %656 = vmatpush.msrb.mxu1 %v848_v1  ;;  %676 = vmatpush.msrb.mxu2 %v890_v9  ;;  %v1597_v1 = vld [vmem:[#allocation4_spill] sm:$0xff] }
 0x2aa   :  { %614 = vmatpush.msrb.mxu0 %v872_v6  ;;  %v472_v6 = vrot.slane %v750_v3, 4 }
 0x2ab   :  { %657 = vmatpush.msrb.mxu1 %v860_v4  ;;  %677 = vmatpush.msrb.mxu2 %v901_v11 }
 0x2ac   :  { %615 = vmatpush.msrb.mxu0 %v896_v10 }
 0x2ad   :  { %658 = vmatpush.msrb.mxu1 %v883_v8  ;;  %678 = vmatpush.msrb.mxu2 %v920_v14 }
 0x2ae   :  { %616 = vmatpush.msrb.mxu0 %v915_v13 }
 0x2af   :  { %659 = vmatpush.msrb.mxu1 %v907_v12  ;;  %679 = vmatpush.msrb.mxu2 %v939_v17 }
 0x2b0   :  { %617 = vmatpush.msrb.mxu0 %v934_v16  ;;  %v751_v16 = vld [vmem:[%s1582_s0 + $0x38] sm:$0xf] }
 0x2b1   :  { %660 = vmatpush.msrb.mxu1 %v926_v15  ;;  %680 = vmatpush.msrb.mxu2 %v958_v20 }
 0x2b2   :  { %618 = vmatpush.msrb.mxu0 %v953_v19 }
 0x2b3   :  { %661 = vmatpush.msrb.mxu1 %v945_v18  ;;  %681 = vmatpush.msrb.mxu2 %v977_v23 }
 0x2b4   :  { %619 = vmatpush.msrb.mxu0 %v972_v22 }
 0x2b5   :  { %662 = vmatpush.msrb.mxu1 %v964_v21  ;;  %682 = vmatpush.msrb.mxu2 %v996_v26  ;;  %v808_v26 = vld [vmem:[%s1580_s1 + $0x178] sm:$0xff] }
 0x2b6   :  { %620 = vmatpush.msrb.mxu0 %v991_v25 }
 0x2b7   :  { %663 = vmatpush.msrb.mxu1 %v983_v24  ;;  %683 = vmatpush.msrb.mxu2 %v1015_v29  ;;  %v811_v29 = vld [vmem:[%s1580_s1 + $0x130] sm:$0xff] }
 0x2b8   :  { %621 = vmatpush.msrb.mxu0 %v1010_v28  ;;  %v810_v28 = vld [vmem:[%s1580_s1 + $0x148] sm:$0xff] }
 0x2b9   :  { %664 = vmatpush.msrb.mxu1 %v1002_v27  ;;  %684 = vmatpush.msrb.mxu2 %v1034_v32  ;;  %v809_v27 = vld [vmem:[%s1580_s1 + $0x160] sm:$0xff]  ;;  %v814_v32 = vld [vmem:[%s1580_s1 + $0xe8] sm:$0xff] }
 0x2ba   :  { %622 = vmatpush.msrb.mxu0 %v1029_v31  ;;  %v813_v31 = vld [vmem:[%s1580_s1 + $0x100] sm:$0xff] }
 0x2bb   :  { %665 = vmatpush.msrb.mxu1 %v1021_v30  ;;  %685 = vmatpush.msrb.mxu2 %v1053_v35  ;;  %v812_v30 = vld [vmem:[%s1580_s1 + $0x118] sm:$0xff] }
 0x2bc   :  { %623 = vmatpush.msrb.mxu0 %v1048_v34  ;;  %v816_v35 = vld [vmem:[%s1580_s1 + $0xb8] sm:$0xff] }
 0x2bd   :  { %666 = vmatpush.msrb.mxu1 %v1040_v33  ;;  %686 = vmatpush.msrb.mxu2 %v1072_v38  ;;  %v815_v33 = vld [vmem:[%s1580_s1 + $0xd0] sm:$0xff]  ;;  %v818_v38 = vld [vmem:[%s1580_s1 + $0x88] sm:$0xff] }
 0x2be   :  { %624 = vmatpush.msrb.mxu0 %v1067_v37 }
 0x2bf   :  { %667 = vmatpush.msrb.mxu1 %v1059_v36  ;;  %687 = vmatpush.msrb.mxu2 %v1091_v41  ;;  %v817_v36 = vld [vmem:[%s1580_s1 + $0xa0] sm:$0xff] }
 0x2c0   :  { %625 = vmatpush.msrb.mxu0 %v1086_v40 }
 0x2c1   :  { %668 = vmatpush.msrb.mxu1 %v1078_v39  ;;  %688 = vmatpush.msrb.mxu2 %v1110_v44  ;;  %v752_v39 = vld [vmem:[%s1582_s0 + $0x3c] sm:$0xff] }
 0x2c2   :  { %626 = vmatpush.msrb.mxu0 %v1105_v43  ;;  %v555_v44 = vrot.slane %v752_v39, 4 }
 0x2c3   :  { %669 = vmatpush.msrb.mxu1 %v1097_v42  ;;  %689 = vmatpush.msrb.mxu2 %v1134_v48 }
 0x2c4   :  { %627 = vmatpush.msrb.mxu0 %v1126_v47 }
 0x2c5   :  { %670 = vmatpush.msrb.mxu1 %v1596_v0  ;;  %690 = vmatpush.msrb.mxu2 %v1597_v1 }
 0x322   :  { %v423_v4 = vpop.f32.mrf.mxu0  ;;  %v443_v8 = vpop.f32.mrf.mxu1 }
 0x323   :  { %v466_v5 = vadd.f32 %v750_v3, %v423_v4  ;;  %v474_v9 = vadd.f32 %v472_v6, %v443_v8 }
 0x325   :  { %v467_v7 = vmul.f32 0.5, %v466_v5  ;;  %v475_v10 = vmul.f32 0.5, %v474_v9 }
 0x327   :  { %784 = vtanh.f32 %v467_v7 }
 0x328   :  { %786 = vtanh.f32 %v475_v10  ;;  %v755_v10 = vld [vmem:[%s1582_s0 + $0x50] sm:$0xf] }
 0x329   :  { %v463_v12 = vpop.f32.mrf.mxu2 }
 0x32a   :  { %v479_v15 = vadd.f32 %v1267_v58, %v463_v12 }
 0x32d   :  { %v785_v11 = vpop.eup %784 }
 0x32e   :  { %v469_v13 = vadd.f32 1.0, %v785_v11  ;;  %v787_v19 = vpop.eup %786 }
 0x32f   :  { %v477_v20 = vadd.f32 1.0, %v787_v19 }
 0x330   :  { %v470_v14 = vmul.f32 0.5, %v469_v13 }
 0x331   :  { %v478_v22 = vmul.f32 0.5, %v477_v20  ;;  %v756_v20 = vld [vmem:[%s1582_s0 + $0x54] sm:$0xff] }
 0x332   :  { %v480_v17 = vmul.f32 %v479_v15, %v470_v14 }
 0x334   :  { %v481_v18 = vadd.f32 %v751_v16, %v480_v17 }
 0x336   :  { %788 = vtanh.f32 %v481_v18 }
 0x33c   :  { %v789_v21 = vpop.eup %788 }
 0x33d   :  { %v483_v23 = vsub.f32 %v1457_v61, %v789_v21  ;;  %v638_v61 = vrot.slane %v754_v57, 4 }
 0x33f   :  { %v484_v24 = vmul.f32 %v483_v23, %v478_v22 }
 0x341   :  { %v485_v25 = vadd.f32 %v789_v21, %v484_v24  ;;  %v721_v24 = vrot.slane %v756_v20, 4 }
 0x343   :  { %505 = vmatmul.f32.vlgmr.msrb.gmra.mxu3 %v485_v25  ;;  %525 = vmatmul.f32.vlgmr.msra.gmra.mxu0 %v485_v25 }
 0x344   :  { %545 = vmatmul.f32.vlgmr.msra.gmra.mxu1 %v485_v25  ;;  %695 = vmatpush.msrb.mxu3 %v808_v26 }
 0x346   :  { %696 = vmatpush.msrb.mxu3 %v809_v27 }
 0x348   :  { %697 = vmatpush.msrb.mxu3 %v810_v28 }
 0x34a   :  { %698 = vmatpush.msrb.mxu3 %v811_v29 }
 0x34c   :  { %699 = vmatpush.msrb.mxu3 %v812_v30 }
 0x34e   :  { %700 = vmatpush.msrb.mxu3 %v813_v31 }
 0x350   :  { %701 = vmatpush.msrb.mxu3 %v814_v32 }
 0x352   :  { %702 = vmatpush.msrb.mxu3 %v815_v33  ;;  %v757_v33 = vld [vmem:[%s1582_s0 + $0x5c] sm:$0xf] }
 0x354   :  { %703 = vmatpush.msrb.mxu3 %v816_v35 }
 0x356   :  { %704 = vmatpush.msrb.mxu3 %v817_v36 }
 0x358   :  { %705 = vmatpush.msrb.mxu3 %v818_v38 }
 0x35a   :  { %706 = vmatpush.msrb.mxu3 %v1048_v34 }
 0x35c   :  { %707 = vmatpush.msrb.mxu3 %v1067_v37 }
 0x35e   :  { %708 = vmatpush.msrb.mxu3 %v1086_v40 }
 0x360   :  { %709 = vmatpush.msrb.mxu3 %v1105_v43 }
 0x362   :  { %710 = vmatpush.msrb.mxu3 %v1126_v47  ;;  %v753_v47 = vld [vmem:[%s1582_s0 + $0x44] sm:$0xf] }
 0x3c0   :  { %v526_v48 = vpop.f32.mrf.mxu0 }
 0x3c1   :  { %v557_v2 = vadd.f32 %v555_v44, %v526_v48  ;;  %v546_v37 = vpop.f32.mrf.mxu1 }
 0x3c2   :  { %v562_v40 = vadd.f32 %v1267_v58, %v546_v37 }
 0x3c3   :  { %v558_v34 = vmul.f32 0.5, %v557_v2 }
 0x3c6   :  { %v506_v41 = vpop.f32.mrf.mxu3 }
 0x3c7   :  { %v549_v42 = vadd.f32 %v752_v39, %v506_v41 }
 0x3c9   :  { %v550_v55 = vmul.f32 0.5, %v549_v42 }
 0x3cb   :  { %790 = vtanh.f32 %v550_v55 }
 0x3cc   :  { %792 = vtanh.f32 %v558_v34 }
 0x3d1   :  { %v791_v45 = vpop.eup %790 }
 0x3d2   :  { %v552_v62 = vadd.f32 1.0, %v791_v45  ;;  %v793_v51 = vpop.eup %792 }
 0x3d3   :  { %v560_v53 = vadd.f32 1.0, %v793_v51 }
 0x3d4   :  { %v553_v43 = vmul.f32 0.5, %v552_v62 }
 0x3d5   :  { %v561_v54 = vmul.f32 0.5, %v560_v53 }
 0x3d6   :  { %v563_v50 = vmul.f32 %v562_v40, %v553_v43 }
 0x3d8   :  { %v564_v49 = vadd.f32 %v753_v47, %v563_v50 }
 0x3da   :  { %794 = vtanh.f32 %v564_v49 }
 0x3e0   :  { %v795_v52 = vpop.eup %794 }
 0x3e1   :  { %v566_v56 = vsub.f32 %v485_v25, %v795_v52 }
 0x3e3   :  { %v567_v46 = vmul.f32 %v566_v56, %v561_v54 }
 0x3e5   :  { %v568_v59 = vadd.f32 %v795_v52, %v567_v46 }
 0x3e7   :  { %588 = vmatmul.f32.vlgmr.msra.gmra.mxu2 %v568_v59  ;;  %608 = vmatmul.f32.vlgmr.msra.gmra.mxu3 %v568_v59 }
 0x3e8   :  { %628 = vmatmul.f32.vlgmr.msrb.gmra.mxu0 %v568_v59 }
 0x465   :  { %v629_v6 = vpop.f32.mrf.mxu0 }
 0x466   :  { %v645_v8 = vadd.f32 %v1267_v58, %v629_v6 }
 0x46a   :  { %v589_v60 = vpop.f32.mrf.mxu2  ;;  %v609_v1 = vpop.f32.mrf.mxu3 }
 0x46b   :  { %v632_v63 = vadd.f32 %v754_v57, %v589_v60  ;;  %v640_v3 = vadd.f32 %v638_v61, %v609_v1 }
 0x46d   :  { %v633_v0 = vmul.f32 0.5, %v632_v63  ;;  %v641_v4 = vmul.f32 0.5, %v640_v3 }
 0x46f   :  { %796 = vtanh.f32 %v633_v0 }
 0x470   :  { %798 = vtanh.f32 %v641_v4 }
 0x475   :  { %v797_v5 = vpop.eup %796 }
 0x476   :  { %v635_v7 = vadd.f32 1.0, %v797_v5  ;;  %v799_v13 = vpop.eup %798 }
 0x477   :  { %v643_v14 = vadd.f32 1.0, %v799_v13 }
 0x478   :  { %v636_v9 = vmul.f32 0.5, %v635_v7 }
 0x479   :  { %v644_v16 = vmul.f32 0.5, %v643_v14 }
 0x47a   :  { %v646_v11 = vmul.f32 %v645_v8, %v636_v9 }
 0x47c   :  { %v647_v12 = vadd.f32 %v755_v10, %v646_v11 }
 0x47e   :  { %800 = vtanh.f32 %v647_v12 }
 0x484   :  { %v801_v15 = vpop.eup %800 }
 0x485   :  { %v649_v17 = vsub.f32 %v568_v59, %v801_v15 }
 0x487   :  { %v650_v18 = vmul.f32 %v649_v17, %v644_v16 }
 0x489   :  { %v651_v19 = vadd.f32 %v801_v15, %v650_v18 }
 0x48b   :  { %671 = vmatmul.f32.vlgmr.msrb.gmra.mxu1 %v651_v19  ;;  %691 = vmatmul.f32.vlgmr.msrb.gmra.mxu2 %v651_v19 }
 0x48c   :  { %711 = vmatmul.f32.vlgmr.msrb.gmra.mxu3 %v651_v19 }
 0x508   :  { %v672_v21 = vpop.f32.mrf.mxu1 }
 0x509   :  { %v715_v22 = vadd.f32 %v756_v20, %v672_v21 }
 0x50b   :  { %v716_v23 = vmul.f32 0.5, %v715_v22 }
 0x50d   :  { %802 = vtanh.f32 %v716_v23 }
 0x50e   :  { %v692_v25 = vpop.f32.mrf.mxu2 }
 0x50f   :  { %v723_v26 = vadd.f32 %v721_v24, %v692_v25  ;;  %v712_v29 = vpop.f32.mrf.mxu3 }
 0x510   :  { %v728_v32 = vadd.f32 %v1267_v58, %v712_v29 }
 0x511   :  { %v724_v27 = vmul.f32 0.5, %v723_v26 }
 0x513   :  { %v803_v28 = vpop.eup %802  ;;  %804 = vtanh.f32 %v724_v27 }
 0x514   :  { %v718_v30 = vadd.f32 1.0, %v803_v28 }
 0x516   :  { %v719_v31 = vmul.f32 0.5, %v718_v30 }
 0x518   :  { %v729_v35 = vmul.f32 %v728_v32, %v719_v31 }
 0x519   :  { %v805_v38 = vpop.eup %804 }
 0x51a   :  { %v730_v36 = vadd.f32 %v757_v33, %v729_v35  ;;  %v726_v39 = vadd.f32 1.0, %v805_v38 }
 0x51c   :  { %806 = vtanh.f32 %v730_v36  ;;  %v727_v42 = vmul.f32 0.5, %v726_v39 }
 0x522   :  { %v807_v41 = vpop.eup %806 }
 0x523   :  { %v732_v44 = vsub.f32 %v651_v19, %v807_v41 }
 0x525   :  { %v733_v48 = vmul.f32 %v732_v44, %v727_v42 }
 0x527   :  { %v734_v55 = vadd.f32 %v807_v41, %v733_v48 }
 0x529   :  { %735 = vst [vmem:[#allocation2] sm:$0xf] %v734_v55 }
 0x52a   :  { %739 = vst [vmem:[%s1583_s3] sm:$0xf] %v734_v55 }

</bundles_post_ra>
